<compile_context>
chip_gen: v7x
topology: tpu7x:2x2x1
jax: 0.10.0
libtpu: 0.0.40
codegen_flags: <defaults>
</compile_context>

<pallas_src>
import functools

import jax
import jax.numpy as jnp
import numpy as np
from jax.experimental import pallas as pl
from jax.experimental.pallas import tpu as pltpu

_PMAX = 3    # widest "same" padding in the net (7x7 conv, pad=3)
_CPAD = 8    # channels padded 3 -> 8 (one sublane tile) per activation group
_LANE = 128  # flattened plane length is padded to a multiple of this


def _aodnet_kernel(x_ref, int_ref, w1, b1, w2, b2, w3, b3, w4, b4, w5, b5,
                   o_ref, *, Wp):
    """Whole AOD-Net forward pass for one batch element.

    x_ref:   (1, 8, Lp)  input: zero-border padded plane, flattened, lane-padded,
                         channels 3..7 = 0
    int_ref: (8, Lp)     interior mask (1.0 inside the HxW image, 0.0 elsewhere)
    w*:      (K*8, K*G*8) weights; row = kw*8 + co, col = kh*(G*8) + g*8 + c
    b*:      (8, 1)      biases (rows 3..7 zero)
    o_ref:   (1, 8, Lp)  output in the same padded layout (wrapper slices it)
    """
    interior = int_ref[...]                                    # (8, Lp)
    Lp = interior.shape[-1]

    def rotl(a, s):
        # out[..., p] = a[..., (p + s) mod Lp]  (static left rotate).
        # |s| <= 3*Wp + 3 << Lp, so interior positions never read wrapped
        # lanes; wrapped values only land on border lanes, which are masked.
        s = s % Lp
        if s == 0:
            return a
        return jnp.concatenate([a[:, s:], a[:, :s]], axis=1)

    def conv_relu(act, w_ref, b_ref, K, pad):
        # act: (8*G, Lp) zero-border activations.
        # Row taps (kh) live in the matmul contraction via a row-shifted
        # activation stack; column taps (kw) are combined with K small lane
        # shifts + adds.  Bias + ReLU + interior mask fused in the epilogue.
        if K == 1:
            a_stack = act
        else:
            a_stack = jnp.concatenate(
                [rotl(act, (kh - pad) * Wp) for kh in range(K)], axis=0)
        p_all = jnp.dot(w_ref[...], a_stack,
                        preferred_element_type=jnp.float32)    # (K*8, Lp)
        out = None
        for kw in range(K):
            contrib = rotl(p_all[kw * 8:(kw + 1) * 8, :], kw - pad)
            out = contrib if out is None else out + contrib
        return jnp.maximum(out + b_ref[...], 0.0) * interior   # (8, Lp)

    x = x_ref[0]                                               # (8, Lp)
    x1 = conv_relu(x, w1, b1, K=1, pad=0)
    x2 = conv_relu(x1, w2, b2, K=3, pad=1)
    x3 = conv_relu(jnp.concatenate([x1, x2], axis=0), w3, b3, K=5, pad=2)
    x4 = conv_relu(jnp.concatenate([x2, x3], axis=0), w4, b4, K=7, pad=3)
    x5 = conv_relu(jnp.concatenate([x1, x2, x3, x4], axis=0), w5, b5, K=3, pad=1)
    # AOD-Net recovery, fused epilogue: clean = relu(x5 * x - x5 + 1)
    o_ref[0] = jnp.maximum(x5 * x - x5 + 1.0, 0.0)


def _prep_w(w, groups):
    """(3, 3*G, K, K) conv weight -> (K*8, K*G*8) MXU matrix (zero padded).

    Row    index = kw*8 + co             (column taps x output channels)
    Column index = kh*(G*8) + g*8 + c    (row taps x padded input channels)
    """
    cout, cin, K, _ = w.shape
    w = w.astype(jnp.float32).reshape(cout, groups, 3, K, K)    # (co,g,c,kh,kw)
    w = jnp.transpose(w, (4, 0, 3, 1, 2))                       # (kw,co,kh,g,c)
    w = jnp.pad(w, ((0, 0), (0, _CPAD - cout), (0, 0), (0, 0), (0, _CPAD - 3)))
    return w.reshape(K * _CPAD, K * groups * _CPAD)


def _prep_b(b):
    return jnp.pad(b.astype(jnp.float32).reshape(-1, 1),
                   ((0, _CPAD - b.shape[0]), (0, 0)))


@jax.jit
def aodnet_forward(x, params):
    N, C, H, W = x.shape
    assert C == 3, "AOD-Net takes 3-channel input"
    Hp, Wp = H + 2 * _PMAX, W + 2 * _PMAX
    L = Hp * Wp
    Lp = ((L + _LANE - 1) // _LANE) * _LANE        # lane-pad to multiple of 128

    # Lane-dense, zero-border, channel-padded layout: (N, 8, Lp).
    xp = jnp.pad(x.astype(jnp.float32),
                 ((0, 0), (0, _CPAD - C), (_PMAX, _PMAX), (_PMAX, _PMAX)))
    xp = xp.reshape(N, _CPAD, L)
    xp = jnp.pad(xp, ((0, 0), (0, 0), (0, Lp - L)))

    interior = np.zeros((Hp, Wp), np.float32)
    interior[_PMAX:_PMAX + H, _PMAX:_PMAX + W] = 1.0
    interior = np.pad(interior.reshape(L), (0, Lp - L))
    interior = jnp.asarray(np.ascontiguousarray(
        np.broadcast_to(interior, (_CPAD, Lp))))

    groups = (1, 1, 2, 2, 4)   # x | x1 | [x1,x2] | [x2,x3] | [x1,x2,x3,x4]
    ws = [_prep_w(params[f"w{i}"], g) for i, g in zip(range(1, 6), groups)]
    bs = [_prep_b(params[f"b{i}"]) for i in range(1, 6)]

    def full_spec(arr):
        nd = arr.ndim
        return pl.BlockSpec(arr.shape, lambda n, _nd=nd: (0,) * _nd)

    in_specs = [pl.BlockSpec((1, _CPAD, Lp), lambda n: (n, 0, 0)),
                full_spec(interior)]
    args = [xp, interior]
    for w, b in zip(ws, bs):
        in_specs += [full_spec(w), full_spec(b)]
        args += [w, b]

    out = pl.pallas_call(
        functools.partial(_aodnet_kernel, Wp=Wp),
        out_shape=jax.ShapeDtypeStruct((N, _CPAD, Lp), jnp.float32),
        grid=(N,),
        in_specs=in_specs,
        out_specs=pl.BlockSpec((1, _CPAD, Lp), lambda n: (n, 0, 0)),
        compiler_params=pltpu.CompilerParams(
            dimension_semantics=("parallel",)),
    )(*args)

    out = out[:, :, :L].reshape(N, _CPAD, Hp, Wp)
    return out[:, :C, _PMAX:_PMAX + H, _PMAX:_PMAX + W]


# ----------------------------------------------------------------------------
# Pure-JAX reference (for correctness check)
# ----------------------------------------------------------------------------
def _conv_ref(x, w, b, pad):
    y = jax.lax.conv_general_dilated(
        x, w, window_strides=(1, 1), padding=[(pad, pad), (pad, pad)],
        dimension_numbers=("NCHW", "OIHW", "NCHW"),
        precision=jax.lax.Precision.HIGHEST)
    return jnp.maximum(y + b[None, :, None, None], 0.0)


def aodnet_ref(x, p):
    x1 = _conv_ref(x, p["w1"], p["b1"], 0)
    x2 = _conv_ref(x1, p["w2"], p["b2"], 1)
    x3 = _conv_ref(jnp.concatenate((x1, x2), 1), p["w3"], p["b3"], 2)
    x4 = _conv_ref(jnp.concatenate((x2, x3), 1), p["w4"], p["b4"], 3)
    x5 = _conv_ref(jnp.concatenate((x1, x2, x3, x4), 1), p["w5"], p["b5"], 1)
    return jnp.maximum(x5 * x - x5 + 1.0, 0.0)


def make_params(key):
    shapes = {
        "w1": (3, 3, 1, 1), "w2": (3, 3, 3, 3), "w3": (3, 6, 5, 5),
        "w4": (3, 6, 7, 7), "w5": (3, 12, 3, 3),
    }
    params = {}
    keys = jax.random.split(key, 10)
    for i, (name, shp) in enumerate(shapes.items()):
        fan_in = shp[1] * shp[2] * shp[3]
        bound = 1.0 / (fan_in ** 0.5)
        params[name] = jax.random.uniform(
            keys[2 * i], shp, jnp.float32, minval=-bound, maxval=bound)
        params["b" + name[1:]] = jax.random.uniform(
            keys[2 * i + 1], (shp[0],), jnp.float32, minval=-bound, maxval=bound)
    return params


if __name__ == "__main__":
    key = jax.random.PRNGKey(0)
    k_x, k_p = jax.random.split(key)
    # NCHW input, batch=2, channels=3 (fixed by the module), spatial=16x16
    x = jax.random.uniform(k_x, (2, 3, 16, 16), jnp.float32)
    params = make_params(k_p)

    out = aodnet_forward(x, params)
    out = jax.block_until_ready(out)

    ref = aodnet_ref(x, params)
    assert out.shape == (2, 3, 16, 16)
    assert jnp.allclose(out, ref, rtol=2e-3, atol=2e-3), "mismatch vs JAX reference"

    print("KERNEL_OK")
</pallas_src>

<mosaic_0001>
module attributes {stable_mosaic.version = 11 : i64} {
  func.func @_aodnet_kernel(%arg0: i32, %arg1: memref<1x8x512xf32, #tpu.memory_space<vmem>>, %arg2: memref<8x512xf32, #tpu.memory_space<vmem>>, %arg3: memref<8x8xf32, #tpu.memory_space<vmem>>, %arg4: memref<8x1xf32, #tpu.memory_space<vmem>>, %arg5: memref<24x24xf32, #tpu.memory_space<vmem>>, %arg6: memref<8x1xf32, #tpu.memory_space<vmem>>, %arg7: memref<40x80xf32, #tpu.memory_space<vmem>>, %arg8: memref<8x1xf32, #tpu.memory_space<vmem>>, %arg9: memref<56x112xf32, #tpu.memory_space<vmem>>, %arg10: memref<8x1xf32, #tpu.memory_space<vmem>>, %arg11: memref<24x96xf32, #tpu.memory_space<vmem>>, %arg12: memref<8x1xf32, #tpu.memory_space<vmem>>, %arg13: memref<1x8x512xf32, #tpu.memory_space<vmem>>) attributes {dimension_semantics = [#tpu.dimension_semantics<parallel>], iteration_bounds = array<i64: 2>, scalar_prefetch = 0 : i64, scratch_operands = 0 : i64, tpu.core_type = #tpu.core_type<tc>, window_params = [{transform_indices = @transform_0, window_bounds = array<i64: 1, 8, 512>}, {pipeline_mode = #tpu.pipeline_mode<synchronous>, transform_indices = @transform_1, window_bounds = array<i64: 8, 512>}, {pipeline_mode = #tpu.pipeline_mode<synchronous>, transform_indices = @transform_2, window_bounds = array<i64: 8, 8>}, {pipeline_mode = #tpu.pipeline_mode<synchronous>, transform_indices = @transform_3, window_bounds = array<i64: 8, 1>}, {pipeline_mode = #tpu.pipeline_mode<synchronous>, transform_indices = @transform_4, window_bounds = array<i64: 24, 24>}, {pipeline_mode = #tpu.pipeline_mode<synchronous>, transform_indices = @transform_5, window_bounds = array<i64: 8, 1>}, {pipeline_mode = #tpu.pipeline_mode<synchronous>, transform_indices = @transform_6, window_bounds = array<i64: 40, 80>}, {pipeline_mode = #tpu.pipeline_mode<synchronous>, transform_indices = @transform_7, window_bounds = array<i64: 8, 1>}, {pipeline_mode = #tpu.pipeline_mode<synchronous>, transform_indices = @transform_8, window_bounds = array<i64: 56, 112>}, {pipeline_mode = #tpu.pipeline_mode<synchronous>, transform_indices = @transform_9, window_bounds = array<i64: 8, 1>}, {pipeline_mode = #tpu.pipeline_mode<synchronous>, transform_indices = @transform_10, window_bounds = array<i64: 24, 96>}, {pipeline_mode = #tpu.pipeline_mode<synchronous>, transform_indices = @transform_11, window_bounds = array<i64: 8, 1>}, {transform_indices = @transform_12, window_bounds = array<i64: 1, 8, 512>}]} {
    %c0 = arith.constant 0 : index
    %c0_0 = arith.constant 0 : index
    %0 = vector.load %arg2[%c0, %c0_0] : memref<8x512xf32, #tpu.memory_space<vmem>>, vector<8x512xf32>
    %c0_1 = arith.constant 0 : index
    %c0_2 = arith.constant 0 : index
    %c0_3 = arith.constant 0 : index
    %1 = vector.load %arg1[%c0_1, %c0_2, %c0_3] : memref<1x8x512xf32, #tpu.memory_space<vmem>>, vector<1x8x512xf32>
    %2 = vector.shape_cast %1 : vector<1x8x512xf32> to vector<8x512xf32>
    %c0_4 = arith.constant 0 : index
    %c0_5 = arith.constant 0 : index
    %3 = vector.load %arg3[%c0_4, %c0_5] : memref<8x8xf32, #tpu.memory_space<vmem>>, vector<8x8xf32>
    %cst = arith.constant dense<0.000000e+00> : vector<8x512xf32>
    %4 = tpu.matmul %3, %2, %cst {dimension_numbers = #tpu.dot_dimension_numbers<[1], [0], [0], [1], [0, 0, 1, 1], [], []>} : vector<8x8xf32>, vector<8x512xf32>, vector<8x512xf32> -> vector<8x512xf32>
    %c0_6 = arith.constant 0 : index
    %c0_7 = arith.constant 0 : index
    %5 = vector.load %arg4[%c0_6, %c0_7] : memref<8x1xf32, #tpu.memory_space<vmem>>, vector<8x1xf32>
    %6 = vector.broadcast %5 : vector<8x1xf32> to vector<8x512xf32>
    %7 = arith.addf %4, %6 : vector<8x512xf32>
    %cst_8 = arith.constant 0.000000e+00 : f32
    %8 = vector.broadcast %cst_8 : f32 to vector<8x512xf32>
    %9 = arith.maximumf %7, %8 : vector<8x512xf32>
    %10 = arith.mulf %9, %0 : vector<8x512xf32>
    %11 = vector.extract_strided_slice %10 {offsets = [0, 490], sizes = [8, 22], strides = [1, 1]} : vector<8x512xf32> to vector<8x22xf32>
    %12 = vector.extract_strided_slice %10 {offsets = [0, 0], sizes = [8, 490], strides = [1, 1]} : vector<8x512xf32> to vector<8x490xf32>
    %13 = tpu.concatenate %11, %12 in 1 : vector<8x22xf32>, vector<8x490xf32> -> vector<8x512xf32>
    %14 = vector.extract_strided_slice %10 {offsets = [0, 22], sizes = [8, 490], strides = [1, 1]} : vector<8x512xf32> to vector<8x490xf32>
    %15 = vector.extract_strided_slice %10 {offsets = [0, 0], sizes = [8, 22], strides = [1, 1]} : vector<8x512xf32> to vector<8x22xf32>
    %16 = tpu.concatenate %14, %15 in 1 : vector<8x490xf32>, vector<8x22xf32> -> vector<8x512xf32>
    %17 = tpu.concatenate %13, %10, %16 in 0 : vector<8x512xf32>, vector<8x512xf32>, vector<8x512xf32> -> vector<24x512xf32>
    %c0_9 = arith.constant 0 : index
    %c0_10 = arith.constant 0 : index
    %18 = vector.load %arg5[%c0_9, %c0_10] : memref<24x24xf32, #tpu.memory_space<vmem>>, vector<24x24xf32>
    %cst_11 = arith.constant dense<0.000000e+00> : vector<24x512xf32>
    %19 = tpu.matmul %18, %17, %cst_11 {dimension_numbers = #tpu.dot_dimension_numbers<[1], [0], [0], [1], [0, 0, 1, 1], [], []>} : vector<24x24xf32>, vector<24x512xf32>, vector<24x512xf32> -> vector<24x512xf32>
    %20 = vector.extract_strided_slice %19 {offsets = [0, 0], sizes = [8, 512], strides = [1, 1]} : vector<24x512xf32> to vector<8x512xf32>
    %21 = vector.extract_strided_slice %20 {offsets = [0, 511], sizes = [8, 1], strides = [1, 1]} : vector<8x512xf32> to vector<8x1xf32>
    %22 = vector.extract_strided_slice %20 {offsets = [0, 0], sizes = [8, 511], strides = [1, 1]} : vector<8x512xf32> to vector<8x511xf32>
    %23 = tpu.concatenate %21, %22 in 1 : vector<8x1xf32>, vector<8x511xf32> -> vector<8x512xf32>
    %24 = vector.extract_strided_slice %19 {offsets = [8, 0], sizes = [8, 512], strides = [1, 1]} : vector<24x512xf32> to vector<8x512xf32>
    %25 = arith.addf %23, %24 : vector<8x512xf32>
    %26 = vector.extract_strided_slice %19 {offsets = [16, 0], sizes = [8, 512], strides = [1, 1]} : vector<24x512xf32> to vector<8x512xf32>
    %27 = vector.extract_strided_slice %26 {offsets = [0, 1], sizes = [8, 511], strides = [1, 1]} : vector<8x512xf32> to vector<8x511xf32>
    %28 = vector.extract_strided_slice %26 {offsets = [0, 0], sizes = [8, 1], strides = [1, 1]} : vector<8x512xf32> to vector<8x1xf32>
    %29 = tpu.concatenate %27, %28 in 1 : vector<8x511xf32>, vector<8x1xf32> -> vector<8x512xf32>
    %30 = arith.addf %25, %29 : vector<8x512xf32>
    %c0_12 = arith.constant 0 : index
    %c0_13 = arith.constant 0 : index
    %31 = vector.load %arg6[%c0_12, %c0_13] : memref<8x1xf32, #tpu.memory_space<vmem>>, vector<8x1xf32>
    %32 = vector.broadcast %31 : vector<8x1xf32> to vector<8x512xf32>
    %33 = arith.addf %30, %32 : vector<8x512xf32>
    %cst_14 = arith.constant 0.000000e+00 : f32
    %34 = vector.broadcast %cst_14 : f32 to vector<8x512xf32>
    %35 = arith.maximumf %33, %34 : vector<8x512xf32>
    %36 = arith.mulf %35, %0 : vector<8x512xf32>
    %37 = tpu.concatenate %10, %36 in 0 : vector<8x512xf32>, vector<8x512xf32> -> vector<16x512xf32>
    %38 = vector.extract_strided_slice %37 {offsets = [0, 468], sizes = [16, 44], strides = [1, 1]} : vector<16x512xf32> to vector<16x44xf32>
    %39 = vector.extract_strided_slice %37 {offsets = [0, 0], sizes = [16, 468], strides = [1, 1]} : vector<16x512xf32> to vector<16x468xf32>
    %40 = tpu.concatenate %38, %39 in 1 : vector<16x44xf32>, vector<16x468xf32> -> vector<16x512xf32>
    %41 = vector.extract_strided_slice %37 {offsets = [0, 490], sizes = [16, 22], strides = [1, 1]} : vector<16x512xf32> to vector<16x22xf32>
    %42 = vector.extract_strided_slice %37 {offsets = [0, 0], sizes = [16, 490], strides = [1, 1]} : vector<16x512xf32> to vector<16x490xf32>
    %43 = tpu.concatenate %41, %42 in 1 : vector<16x22xf32>, vector<16x490xf32> -> vector<16x512xf32>
    %44 = vector.extract_strided_slice %37 {offsets = [0, 22], sizes = [16, 490], strides = [1, 1]} : vector<16x512xf32> to vector<16x490xf32>
    %45 = vector.extract_strided_slice %37 {offsets = [0, 0], sizes = [16, 22], strides = [1, 1]} : vector<16x512xf32> to vector<16x22xf32>
    %46 = tpu.concatenate %44, %45 in 1 : vector<16x490xf32>, vector<16x22xf32> -> vector<16x512xf32>
    %47 = vector.extract_strided_slice %37 {offsets = [0, 44], sizes = [16, 468], strides = [1, 1]} : vector<16x512xf32> to vector<16x468xf32>
    %48 = vector.extract_strided_slice %37 {offsets = [0, 0], sizes = [16, 44], strides = [1, 1]} : vector<16x512xf32> to vector<16x44xf32>
    %49 = tpu.concatenate %47, %48 in 1 : vector<16x468xf32>, vector<16x44xf32> -> vector<16x512xf32>
    %50 = tpu.concatenate %40, %43, %37, %46, %49 in 0 : vector<16x512xf32>, vector<16x512xf32>, vector<16x512xf32>, vector<16x512xf32>, vector<16x512xf32> -> vector<80x512xf32>
    %c0_15 = arith.constant 0 : index
    %c0_16 = arith.constant 0 : index
    %51 = vector.load %arg7[%c0_15, %c0_16] : memref<40x80xf32, #tpu.memory_space<vmem>>, vector<40x80xf32>
    %cst_17 = arith.constant dense<0.000000e+00> : vector<40x512xf32>
    %52 = tpu.matmul %51, %50, %cst_17 {dimension_numbers = #tpu.dot_dimension_numbers<[1], [0], [0], [1], [0, 0, 1, 1], [], []>} : vector<40x80xf32>, vector<80x512xf32>, vector<40x512xf32> -> vector<40x512xf32>
    %53 = vector.extract_strided_slice %52 {offsets = [0, 0], sizes = [8, 512], strides = [1, 1]} : vector<40x512xf32> to vector<8x512xf32>
    %54 = vector.extract_strided_slice %53 {offsets = [0, 510], sizes = [8, 2], strides = [1, 1]} : vector<8x512xf32> to vector<8x2xf32>
    %55 = vector.extract_strided_slice %53 {offsets = [0, 0], sizes = [8, 510], strides = [1, 1]} : vector<8x512xf32> to vector<8x510xf32>
    %56 = tpu.concatenate %54, %55 in 1 : vector<8x2xf32>, vector<8x510xf32> -> vector<8x512xf32>
    %57 = vector.extract_strided_slice %52 {offsets = [8, 0], sizes = [8, 512], strides = [1, 1]} : vector<40x512xf32> to vector<8x512xf32>
    %58 = vector.extract_strided_slice %57 {offsets = [0, 511], sizes = [8, 1], strides = [1, 1]} : vector<8x512xf32> to vector<8x1xf32>
    %59 = vector.extract_strided_slice %57 {offsets = [0, 0], sizes = [8, 511], strides = [1, 1]} : vector<8x512xf32> to vector<8x511xf32>
    %60 = tpu.concatenate %58, %59 in 1 : vector<8x1xf32>, vector<8x511xf32> -> vector<8x512xf32>
    %61 = arith.addf %56, %60 : vector<8x512xf32>
    %62 = vector.extract_strided_slice %52 {offsets = [16, 0], sizes = [8, 512], strides = [1, 1]} : vector<40x512xf32> to vector<8x512xf32>
    %63 = arith.addf %61, %62 : vector<8x512xf32>
    %64 = vector.extract_strided_slice %52 {offsets = [24, 0], sizes = [8, 512], strides = [1, 1]} : vector<40x512xf32> to vector<8x512xf32>
    %65 = vector.extract_strided_slice %64 {offsets = [0, 1], sizes = [8, 511], strides = [1, 1]} : vector<8x512xf32> to vector<8x511xf32>
    %66 = vector.extract_strided_slice %64 {offsets = [0, 0], sizes = [8, 1], strides = [1, 1]} : vector<8x512xf32> to vector<8x1xf32>
    %67 = tpu.concatenate %65, %66 in 1 : vector<8x511xf32>, vector<8x1xf32> -> vector<8x512xf32>
    %68 = arith.addf %63, %67 : vector<8x512xf32>
    %69 = vector.extract_strided_slice %52 {offsets = [32, 0], sizes = [8, 512], strides = [1, 1]} : vector<40x512xf32> to vector<8x512xf32>
    %70 = vector.extract_strided_slice %69 {offsets = [0, 2], sizes = [8, 510], strides = [1, 1]} : vector<8x512xf32> to vector<8x510xf32>
    %71 = vector.extract_strided_slice %69 {offsets = [0, 0], sizes = [8, 2], strides = [1, 1]} : vector<8x512xf32> to vector<8x2xf32>
    %72 = tpu.concatenate %70, %71 in 1 : vector<8x510xf32>, vector<8x2xf32> -> vector<8x512xf32>
    %73 = arith.addf %68, %72 : vector<8x512xf32>
    %c0_18 = arith.constant 0 : index
    %c0_19 = arith.constant 0 : index
    %74 = vector.load %arg8[%c0_18, %c0_19] : memref<8x1xf32, #tpu.memory_space<vmem>>, vector<8x1xf32>
    %75 = vector.broadcast %74 : vector<8x1xf32> to vector<8x512xf32>
    %76 = arith.addf %73, %75 : vector<8x512xf32>
    %cst_20 = arith.constant 0.000000e+00 : f32
    %77 = vector.broadcast %cst_20 : f32 to vector<8x512xf32>
    %78 = arith.maximumf %76, %77 : vector<8x512xf32>
    %79 = arith.mulf %78, %0 : vector<8x512xf32>
    %80 = tpu.concatenate %36, %79 in 0 : vector<8x512xf32>, vector<8x512xf32> -> vector<16x512xf32>
    %81 = vector.extract_strided_slice %80 {offsets = [0, 446], sizes = [16, 66], strides = [1, 1]} : vector<16x512xf32> to vector<16x66xf32>
    %82 = vector.extract_strided_slice %80 {offsets = [0, 0], sizes = [16, 446], strides = [1, 1]} : vector<16x512xf32> to vector<16x446xf32>
    %83 = tpu.concatenate %81, %82 in 1 : vector<16x66xf32>, vector<16x446xf32> -> vector<16x512xf32>
    %84 = vector.extract_strided_slice %80 {offsets = [0, 468], sizes = [16, 44], strides = [1, 1]} : vector<16x512xf32> to vector<16x44xf32>
    %85 = vector.extract_strided_slice %80 {offsets = [0, 0], sizes = [16, 468], strides = [1, 1]} : vector<16x512xf32> to vector<16x468xf32>
    %86 = tpu.concatenate %84, %85 in 1 : vector<16x44xf32>, vector<16x468xf32> -> vector<16x512xf32>
    %87 = vector.extract_strided_slice %80 {offsets = [0, 490], sizes = [16, 22], strides = [1, 1]} : vector<16x512xf32> to vector<16x22xf32>
    %88 = vector.extract_strided_slice %80 {offsets = [0, 0], sizes = [16, 490], strides = [1, 1]} : vector<16x512xf32> to vector<16x490xf32>
    %89 = tpu.concatenate %87, %88 in 1 : vector<16x22xf32>, vector<16x490xf32> -> vector<16x512xf32>
    %90 = vector.extract_strided_slice %80 {offsets = [0, 22], sizes = [16, 490], strides = [1, 1]} : vector<16x512xf32> to vector<16x490xf32>
    %91 = vector.extract_strided_slice %80 {offsets = [0, 0], sizes = [16, 22], strides = [1, 1]} : vector<16x512xf32> to vector<16x22xf32>
    %92 = tpu.concatenate %90, %91 in 1 : vector<16x490xf32>, vector<16x22xf32> -> vector<16x512xf32>
    %93 = vector.extract_strided_slice %80 {offsets = [0, 44], sizes = [16, 468], strides = [1, 1]} : vector<16x512xf32> to vector<16x468xf32>
    %94 = vector.extract_strided_slice %80 {offsets = [0, 0], sizes = [16, 44], strides = [1, 1]} : vector<16x512xf32> to vector<16x44xf32>
    %95 = tpu.concatenate %93, %94 in 1 : vector<16x468xf32>, vector<16x44xf32> -> vector<16x512xf32>
    %96 = vector.extract_strided_slice %80 {offsets = [0, 66], sizes = [16, 446], strides = [1, 1]} : vector<16x512xf32> to vector<16x446xf32>
    %97 = vector.extract_strided_slice %80 {offsets = [0, 0], sizes = [16, 66], strides = [1, 1]} : vector<16x512xf32> to vector<16x66xf32>
    %98 = tpu.concatenate %96, %97 in 1 : vector<16x446xf32>, vector<16x66xf32> -> vector<16x512xf32>
    %99 = tpu.concatenate %83, %86, %89, %80, %92, %95, %98 in 0 : vector<16x512xf32>, vector<16x512xf32>, vector<16x512xf32>, vector<16x512xf32>, vector<16x512xf32>, vector<16x512xf32>, vector<16x512xf32> -> vector<112x512xf32>
    %c0_21 = arith.constant 0 : index
    %c0_22 = arith.constant 0 : index
    %100 = vector.load %arg9[%c0_21, %c0_22] : memref<56x112xf32, #tpu.memory_space<vmem>>, vector<56x112xf32>
    %cst_23 = arith.constant dense<0.000000e+00> : vector<56x512xf32>
    %101 = tpu.matmul %100, %99, %cst_23 {dimension_numbers = #tpu.dot_dimension_numbers<[1], [0], [0], [1], [0, 0, 1, 1], [], []>} : vector<56x112xf32>, vector<112x512xf32>, vector<56x512xf32> -> vector<56x512xf32>
    %102 = vector.extract_strided_slice %101 {offsets = [0, 0], sizes = [8, 512], strides = [1, 1]} : vector<56x512xf32> to vector<8x512xf32>
    %103 = vector.extract_strided_slice %102 {offsets = [0, 509], sizes = [8, 3], strides = [1, 1]} : vector<8x512xf32> to vector<8x3xf32>
    %104 = vector.extract_strided_slice %102 {offsets = [0, 0], sizes = [8, 509], strides = [1, 1]} : vector<8x512xf32> to vector<8x509xf32>
    %105 = tpu.concatenate %103, %104 in 1 : vector<8x3xf32>, vector<8x509xf32> -> vector<8x512xf32>
    %106 = vector.extract_strided_slice %101 {offsets = [8, 0], sizes = [8, 512], strides = [1, 1]} : vector<56x512xf32> to vector<8x512xf32>
    %107 = vector.extract_strided_slice %106 {offsets = [0, 510], sizes = [8, 2], strides = [1, 1]} : vector<8x512xf32> to vector<8x2xf32>
    %108 = vector.extract_strided_slice %106 {offsets = [0, 0], sizes = [8, 510], strides = [1, 1]} : vector<8x512xf32> to vector<8x510xf32>
    %109 = tpu.concatenate %107, %108 in 1 : vector<8x2xf32>, vector<8x510xf32> -> vector<8x512xf32>
    %110 = arith.addf %105, %109 : vector<8x512xf32>
    %111 = vector.extract_strided_slice %101 {offsets = [16, 0], sizes = [8, 512], strides = [1, 1]} : vector<56x512xf32> to vector<8x512xf32>
    %112 = vector.extract_strided_slice %111 {offsets = [0, 511], sizes = [8, 1], strides = [1, 1]} : vector<8x512xf32> to vector<8x1xf32>
    %113 = vector.extract_strided_slice %111 {offsets = [0, 0], sizes = [8, 511], strides = [1, 1]} : vector<8x512xf32> to vector<8x511xf32>
    %114 = tpu.concatenate %112, %113 in 1 : vector<8x1xf32>, vector<8x511xf32> -> vector<8x512xf32>
    %115 = arith.addf %110, %114 : vector<8x512xf32>
    %116 = vector.extract_strided_slice %101 {offsets = [24, 0], sizes = [8, 512], strides = [1, 1]} : vector<56x512xf32> to vector<8x512xf32>
    %117 = arith.addf %115, %116 : vector<8x512xf32>
    %118 = vector.extract_strided_slice %101 {offsets = [32, 0], sizes = [8, 512], strides = [1, 1]} : vector<56x512xf32> to vector<8x512xf32>
    %119 = vector.extract_strided_slice %118 {offsets = [0, 1], sizes = [8, 511], strides = [1, 1]} : vector<8x512xf32> to vector<8x511xf32>
    %120 = vector.extract_strided_slice %118 {offsets = [0, 0], sizes = [8, 1], strides = [1, 1]} : vector<8x512xf32> to vector<8x1xf32>
    %121 = tpu.concatenate %119, %120 in 1 : vector<8x511xf32>, vector<8x1xf32> -> vector<8x512xf32>
    %122 = arith.addf %117, %121 : vector<8x512xf32>
    %123 = vector.extract_strided_slice %101 {offsets = [40, 0], sizes = [8, 512], strides = [1, 1]} : vector<56x512xf32> to vector<8x512xf32>
    %124 = vector.extract_strided_slice %123 {offsets = [0, 2], sizes = [8, 510], strides = [1, 1]} : vector<8x512xf32> to vector<8x510xf32>
    %125 = vector.extract_strided_slice %123 {offsets = [0, 0], sizes = [8, 2], strides = [1, 1]} : vector<8x512xf32> to vector<8x2xf32>
    %126 = tpu.concatenate %124, %125 in 1 : vector<8x510xf32>, vector<8x2xf32> -> vector<8x512xf32>
    %127 = arith.addf %122, %126 : vector<8x512xf32>
    %128 = vector.extract_strided_slice %101 {offsets = [48, 0], sizes = [8, 512], strides = [1, 1]} : vector<56x512xf32> to vector<8x512xf32>
    %129 = vector.extract_strided_slice %128 {offsets = [0, 3], sizes = [8, 509], strides = [1, 1]} : vector<8x512xf32> to vector<8x509xf32>
    %130 = vector.extract_strided_slice %128 {offsets = [0, 0], sizes = [8, 3], strides = [1, 1]} : vector<8x512xf32> to vector<8x3xf32>
    %131 = tpu.concatenate %129, %130 in 1 : vector<8x509xf32>, vector<8x3xf32> -> vector<8x512xf32>
    %132 = arith.addf %127, %131 : vector<8x512xf32>
    %c0_24 = arith.constant 0 : index
    %c0_25 = arith.constant 0 : index
    %133 = vector.load %arg10[%c0_24, %c0_25] : memref<8x1xf32, #tpu.memory_space<vmem>>, vector<8x1xf32>
    %134 = vector.broadcast %133 : vector<8x1xf32> to vector<8x512xf32>
    %135 = arith.addf %132, %134 : vector<8x512xf32>
    %cst_26 = arith.constant 0.000000e+00 : f32
    %136 = vector.broadcast %cst_26 : f32 to vector<8x512xf32>
    %137 = arith.maximumf %135, %136 : vector<8x512xf32>
    %138 = arith.mulf %137, %0 : vector<8x512xf32>
    %139 = tpu.concatenate %10, %36, %79, %138 in 0 : vector<8x512xf32>, vector<8x512xf32>, vector<8x512xf32>, vector<8x512xf32> -> vector<32x512xf32>
    %140 = vector.extract_strided_slice %139 {offsets = [0, 490], sizes = [32, 22], strides = [1, 1]} : vector<32x512xf32> to vector<32x22xf32>
    %141 = vector.extract_strided_slice %139 {offsets = [0, 0], sizes = [32, 490], strides = [1, 1]} : vector<32x512xf32> to vector<32x490xf32>
    %142 = tpu.concatenate %140, %141 in 1 : vector<32x22xf32>, vector<32x490xf32> -> vector<32x512xf32>
    %143 = vector.extract_strided_slice %139 {offsets = [0, 22], sizes = [32, 490], strides = [1, 1]} : vector<32x512xf32> to vector<32x490xf32>
    %144 = vector.extract_strided_slice %139 {offsets = [0, 0], sizes = [32, 22], strides = [1, 1]} : vector<32x512xf32> to vector<32x22xf32>
    %145 = tpu.concatenate %143, %144 in 1 : vector<32x490xf32>, vector<32x22xf32> -> vector<32x512xf32>
    %146 = tpu.concatenate %142, %139, %145 in 0 : vector<32x512xf32>, vector<32x512xf32>, vector<32x512xf32> -> vector<96x512xf32>
    %c0_27 = arith.constant 0 : index
    %c0_28 = arith.constant 0 : index
    %147 = vector.load %arg11[%c0_27, %c0_28] : memref<24x96xf32, #tpu.memory_space<vmem>>, vector<24x96xf32>
    %cst_29 = arith.constant dense<0.000000e+00> : vector<24x512xf32>
    %148 = tpu.matmul %147, %146, %cst_29 {dimension_numbers = #tpu.dot_dimension_numbers<[1], [0], [0], [1], [0, 0, 1, 1], [], []>} : vector<24x96xf32>, vector<96x512xf32>, vector<24x512xf32> -> vector<24x512xf32>
    %149 = vector.extract_strided_slice %148 {offsets = [0, 0], sizes = [8, 512], strides = [1, 1]} : vector<24x512xf32> to vector<8x512xf32>
    %150 = vector.extract_strided_slice %149 {offsets = [0, 511], sizes = [8, 1], strides = [1, 1]} : vector<8x512xf32> to vector<8x1xf32>
    %151 = vector.extract_strided_slice %149 {offsets = [0, 0], sizes = [8, 511], strides = [1, 1]} : vector<8x512xf32> to vector<8x511xf32>
    %152 = tpu.concatenate %150, %151 in 1 : vector<8x1xf32>, vector<8x511xf32> -> vector<8x512xf32>
    %153 = vector.extract_strided_slice %148 {offsets = [8, 0], sizes = [8, 512], strides = [1, 1]} : vector<24x512xf32> to vector<8x512xf32>
    %154 = arith.addf %152, %153 : vector<8x512xf32>
    %155 = vector.extract_strided_slice %148 {offsets = [16, 0], sizes = [8, 512], strides = [1, 1]} : vector<24x512xf32> to vector<8x512xf32>
    %156 = vector.extract_strided_slice %155 {offsets = [0, 1], sizes = [8, 511], strides = [1, 1]} : vector<8x512xf32> to vector<8x511xf32>
    %157 = vector.extract_strided_slice %155 {offsets = [0, 0], sizes = [8, 1], strides = [1, 1]} : vector<8x512xf32> to vector<8x1xf32>
    %158 = tpu.concatenate %156, %157 in 1 : vector<8x511xf32>, vector<8x1xf32> -> vector<8x512xf32>
    %159 = arith.addf %154, %158 : vector<8x512xf32>
    %c0_30 = arith.constant 0 : index
    %c0_31 = arith.constant 0 : index
    %160 = vector.load %arg12[%c0_30, %c0_31] : memref<8x1xf32, #tpu.memory_space<vmem>>, vector<8x1xf32>
    %161 = vector.broadcast %160 : vector<8x1xf32> to vector<8x512xf32>
    %162 = arith.addf %159, %161 : vector<8x512xf32>
    %cst_32 = arith.constant 0.000000e+00 : f32
    %163 = vector.broadcast %cst_32 : f32 to vector<8x512xf32>
    %164 = arith.maximumf %162, %163 : vector<8x512xf32>
    %165 = arith.mulf %164, %0 : vector<8x512xf32>
    %166 = arith.mulf %165, %2 : vector<8x512xf32>
    %167 = arith.subf %166, %165 : vector<8x512xf32>
    %cst_33 = arith.constant 1.000000e+00 : f32
    %168 = vector.broadcast %cst_33 : f32 to vector<8x512xf32>
    %169 = arith.addf %167, %168 : vector<8x512xf32>
    %cst_34 = arith.constant 0.000000e+00 : f32
    %170 = vector.broadcast %cst_34 : f32 to vector<8x512xf32>
    %171 = arith.maximumf %169, %170 : vector<8x512xf32>
    %c0_35 = arith.constant 0 : index
    %c0_36 = arith.constant 0 : index
    %c0_37 = arith.constant 0 : index
    %172 = vector.load %arg13[%c0_35, %c0_36, %c0_37] : memref<1x8x512xf32, #tpu.memory_space<vmem>>, vector<1x8x512xf32>
    %173 = vector.shape_cast %172 : vector<1x8x512xf32> to vector<8x512xf32>
    %174 = vector.shape_cast %171 : vector<8x512xf32> to vector<1x8x512xf32>
    tpu.vector_store %arg13[%c0_35, %c0_36, %c0_37], %174 {strides = array<i32>} : memref<1x8x512xf32, #tpu.memory_space<vmem>>, vector<1x8x512xf32>,
    return
  }
  func.func @transform_0(%arg0: i32) -> (i32, i32, i32) {
    %c0_i32 = arith.constant 0 : i32
    %c0_i32_0 = arith.constant 0 : i32
    %c0_i32_1 = arith.constant 0 : i32
    return %arg0, %c0_i32, %c0_i32_0 : i32, i32, i32
  }
  func.func @transform_1(%arg0: i32) -> (i32, i32) {
    %c0_i32 = arith.constant 0 : i32
    %c0_i32_0 = arith.constant 0 : i32
    %c0_i32_1 = arith.constant 0 : i32
    return %c0_i32, %c0_i32_0 : i32, i32
  }
  func.func @transform_2(%arg0: i32) -> (i32, i32) {
    %c0_i32 = arith.constant 0 : i32
    %c0_i32_0 = arith.constant 0 : i32
    %c0_i32_1 = arith.constant 0 : i32
    return %c0_i32, %c0_i32_0 : i32, i32
  }
  func.func @transform_3(%arg0: i32) -> (i32, i32) {
    %c0_i32 = arith.constant 0 : i32
    %c0_i32_0 = arith.constant 0 : i32
    %c0_i32_1 = arith.constant 0 : i32
    return %c0_i32, %c0_i32_0 : i32, i32
  }
  func.func @transform_4(%arg0: i32) -> (i32, i32) {
    %c0_i32 = arith.constant 0 : i32
    %c0_i32_0 = arith.constant 0 : i32
    %c0_i32_1 = arith.constant 0 : i32
    return %c0_i32, %c0_i32_0 : i32, i32
  }
  func.func @transform_5(%arg0: i32) -> (i32, i32) {
    %c0_i32 = arith.constant 0 : i32
    %c0_i32_0 = arith.constant 0 : i32
    %c0_i32_1 = arith.constant 0 : i32
    return %c0_i32, %c0_i32_0 : i32, i32
  }
  func.func @transform_6(%arg0: i32) -> (i32, i32) {
    %c0_i32 = arith.constant 0 : i32
    %c0_i32_0 = arith.constant 0 : i32
    %c0_i32_1 = arith.constant 0 : i32
    return %c0_i32, %c0_i32_0 : i32, i32
  }
  func.func @transform_7(%arg0: i32) -> (i32, i32) {
    %c0_i32 = arith.constant 0 : i32
    %c0_i32_0 = arith.constant 0 : i32
    %c0_i32_1 = arith.constant 0 : i32
    return %c0_i32, %c0_i32_0 : i32, i32
  }
  func.func @transform_8(%arg0: i32) -> (i32, i32) {
    %c0_i32 = arith.constant 0 : i32
    %c0_i32_0 = arith.constant 0 : i32
    %c0_i32_1 = arith.constant 0 : i32
    return %c0_i32, %c0_i32_0 : i32, i32
  }
  func.func @transform_9(%arg0: i32) -> (i32, i32) {
    %c0_i32 = arith.constant 0 : i32
    %c0_i32_0 = arith.constant 0 : i32
    %c0_i32_1 = arith.constant 0 : i32
    return %c0_i32, %c0_i32_0 : i32, i32
  }
  func.func @transform_10(%arg0: i32) -> (i32, i32) {
    %c0_i32 = arith.constant 0 : i32
    %c0_i32_0 = arith.constant 0 : i32
    %c0_i32_1 = arith.constant 0 : i32
    return %c0_i32, %c0_i32_0 : i32, i32
  }
  func.func @transform_11(%arg0: i32) -> (i32, i32) {
    %c0_i32 = arith.constant 0 : i32
    %c0_i32_0 = arith.constant 0 : i32
    %c0_i32_1 = arith.constant 0 : i32
    return %c0_i32, %c0_i32_0 : i32, i32
  }
  func.func @transform_12(%arg0: i32) -> (i32, i32, i32) {
    %c0_i32 = arith.constant 0 : i32
    %c0_i32_0 = arith.constant 0 : i32
    %c0_i32_1 = arith.constant 0 : i32
    return %arg0, %c0_i32, %c0_i32_0 : i32, i32, i32
  }
}

</mosaic_0001>

<bundles_post_ra>
// kernel: aodnet_forward.1
= control target key start
LH: loop header
LB: loop body
LE: loop exit
PB: predicated region body
PF: predicated region fallthrough
CT: control target
= control target key end

     0   :  { %s2718_s21 = smov 0   ;;  %s3469_s0 = inlined_call_operand.vmem [shape: f32[2,8,512], index: 0, kind: input, shape index: {}]   ;;  %s3470_s1 = inlined_call_operand.vmem [shape: f32[8,512], index: 1, kind: input, shape index: {}]   ;;  %s3471_s2 = inlined_call_operand.vmem [shape: f32[8,8], index: 2, kind: input, shape index: {}]   ;;  %s3472_s3 = inlined_call_operand.vmem [shape: f32[8,1], index: 3, kind: input, shape index: {}]   ;;  %s3473_s4 = inlined_call_operand.vmem [shape: f32[24,24], index: 4, kind: input, shape index: {}]   ;;  %s3474_s5 = inlined_call_operand.vmem [shape: f32[8,1], index: 5, kind: input, shape index: {}]   ;;  %s3475_s6 = inlined_call_operand.vmem [shape: f32[40,80], index: 6, kind: input, shape index: {}]   ;;  %s3476_s7 = inlined_call_operand.vmem [shape: f32[8,1], index: 7, kind: input, shape index: {}]   ;;  %s3477_s8 = inlined_call_operand.vmem [shape: f32[56,112], index: 8, kind: input, shape index: {}]   ;;  %s3478_s9 = inlined_call_operand.vmem [shape: f32[8,1], index: 9, kind: input, shape index: {}]   ;;  %s3479_s10 = inlined_call_operand.vmem [shape: f32[24,96], index: 10, kind: input, shape index: {}]   ;;  %s3480_s11 = inlined_call_operand.vmem [shape: f32[8,1], index: 11, kind: input, shape index: {}]   ;;  %s3481_s12 = inlined_call_operand.vmem [shape: f32[2,8,512], index: 12, kind: output, shape index: {}]  }
   0x1 LB: > { %s2226_s22 = sadd.s32 4294967295, %s2637_s21   ;;  %p2230_p0 = scmp.ge.s32.totalorder %s2637_s21, 1  ;;  %s2637_s21 = sphi %s2718_s21, %s22_s21  }
   0x2   : > { %p362_p1 = scmp.lt.s32.totalorder %s2637_s21, 3 }
   0x4   : > { %p363_p2 = pnand %p2230_p0, %p362_p1 }
   0x6   : > { %366 = sbr.rel (%p363_p2) target bundleno = 2265 (0x8d9), region = 68 }
   0xd   : > { %p404_p3 = scmp.lt.s32.totalorder %s2226_s22, 1  ;;  %v423_v0 = vld [vmem:[%s3472_s3] sm:$0xff]  ;;  %v3482_v1 = vmov 0.0   ;;  %v2640_v2 = vmov 0   ;;  %vm429_vm0 = vcmask 64512   ;;  %v2758_v16 = vld [vmem:[%s3470_s1 + $0x10] sm:$0xff] }
   0xe   : > { %497 = vmatprep.mubr.f32.mxu0 %v3482_v1  ;;  %568 = vmatprep.mubr.f32.mxu1 %v3482_v1  ;;  %v422_v3 = vld [vmem:[%s3471_s2] sm:$0xff]  ;;  %v2763_v21 = vld [vmem:[%s3470_s1 + $0x8] sm:$0xff]  ;;  %v2768_v22 = vld [vmem:[%s3470_s1 + $0x18] sm:$0xff]  ;;  %s2641_s23 = smov 22   ;;  %s2642_s24 = smov 106   ;;  %vm596_vm1 = vcmask 179200  }
   0xf   : > { %s3501_s22 = smov (!%p404_p3, %s2226_s22), 1  ;;  %2451 = vset.pattern.permute.xlu0 %v2640_v2  ;;  %2462 = vset.pattern.permute.xlu1 %v2640_v2  ;;  %v2753_v15 = vld [vmem:[%s3470_s1] sm:$0xff]  ;;  %vm613_vm2 = vcmask 867328   ;;  %vm626_vm3 = vcmask 195584   ;;  %v624_v55 = vld [vmem:[%s3473_s4 + $0x8] sm:$0xff]  ;;  %v625_v56 = vld [vmem:[%s3473_s4 + $0x10] sm:$0xff] }
  0x10   : > { %426 = vperm.xlu0 %2451, %v423_v0   ;;  %s2275_s25 = sshll.u32 %s3501_s22, 5  ;;  %v854_v31 = vld [vmem:[%s3474_s5] sm:$0xff]  ;;  %s2643_s17 = smov 1   ;;  %vm815_vm4 = vcmask 7168   ;;  %vm840_vm5 = vcmask 1039360   ;;  %vm894_vm6 = vcmask 359424  }
  0x11   : > { %s2739_s28 = scalar_lea.vmem %s3469_s0, %s2275_s25  ;;  %v623_v53 = vld [vmem:[%s3473_s4] sm:$0xff]  ;;  %s2644_s18 = smov 127   ;;  %vm961_vm7 = vcmask 687104   ;;  %vm985_vm8 = vcmask 654336   ;;  %vm1204_vm9 = vcmask 15360   ;;  %vm1279_vm10 = vcmask 1031168  }
  0x12   : > { %v419_v4 = vld [vmem:[%s2739_s28 + $0x8] sm:$0xff]  ;;  %v421_v5 = vld [vmem:[%s2739_s28 + $0x18] sm:$0xff]  ;;  %v418_v6 = vld [vmem:[%s2739_s28] sm:$0xff]  ;;  %s2645_s19 = smov 44   ;;  %s2646_s20 = smov 84   ;;  %vm1333_vm11 = vcmask 539648  }
  0x13   : > { %433 = vmatprep.subr.mxu0 %v419_v4  ;;  %504 = vmatprep.subr.mxu1 %v421_v5  ;;  %v420_v7 = vld [vmem:[%s2739_s28 + $0x10] sm:$0xff]  ;;  %s2647_s13 = smov 2   ;;  %s2648_s14 = smov 126   ;;  %vm1434_vm12 = vcmask 506880   ;;  %vm1460_vm13 = vcmask 916480   ;;  %vm1709_vm14 = vcmask 23552  }
  0x14   : > { %434 = vmatpush1.msra.mxu0 %v418_v6  ;;  %505 = vmatpush1.msra.mxu1 %v420_v7  ;;  %s2649_s15 = smov 66   ;;  %s2650_s16 = smov 62   ;;  %vm1834_vm15 = vcmask 1022976  }
  0x15   : > { %2235 = vmatmul.mubr.msk.f32.vlgmr.msra.gmra.mrb[0].mxu0 %vm429_vm0, %v422_v3  ;;  %2236 = vmatmul.mubr.msk.f32.vlgmr.msra.gmra.mrb[0].mxu1 %vm429_vm0, %v422_v3  ;;  %vm1907_vm0 = vcmask 785408   ;;  %s413_s29 = scalar_lea.vmem %s3481_s12, %s2275_s25 }
  0x16   : > { %700 = vmatprep.mubr.f32.mxu0 %v3482_v1  ;;  %783 = vmatprep.mubr.f32.mxu1 %v3482_v1 }
  0x8f   : > { %v427_v8 = vpop.permute.xlu0 %426 }
  0xe8   : > { %v499_v9 = vpop.f32.mrb[0].mxu0  ;;  %v570_v10 = vpop.f32.mrb[0].mxu1 }
  0xe9   : > { %v500_v11 = vadd.f32 %v499_v9, %v427_v8  ;;  %v571_v12 = vadd.f32 %v570_v10, %v427_v8  ;;  %v501_v13 = vpop.f32.mrb[1].mxu0  ;;  %v572_v14 = vpop.f32.mrb[1].mxu1 }
  0xea   : > { %v502_v17 = vadd.f32 %v501_v13, %v427_v8  ;;  %v573_v18 = vadd.f32 %v572_v14, %v427_v8 }
  0xeb   : > { %v575_v19 = vmax.f32 %v500_v11, 0.0  ;;  %v577_v20 = vmax.f32 %v571_v12, 0.0 }
  0xec   : > { %v576_v23 = vmax.f32 %v502_v17, 0.0  ;;  %v578_v24 = vmax.f32 %v573_v18, 0.0 }
  0xed   : > { %v2771_v25 = vmul.f32 %v575_v19, %v2753_v15  ;;  %v2774_v26 = vmul.f32 %v577_v20, %v2758_v16 }
  0xee   : > { %v2777_v27 = vmul.f32 %v576_v23, %v2763_v21  ;;  %v2780_v28 = vmul.f32 %v578_v24, %v2768_v22 }
  0xf0   : > { %v2457_v29 = vpack.i.bf16 %v2774_v26, %v2777_v27  ;;  %v2452_v30 = vpack.i.bf16 %v2771_v25, %v2780_v28  ;;  %v2463_v6 = vpack.i.bf16 %v2777_v27, %v2771_v25 }
  0xf2   : > { %2458 = vrot.lane.b32.xlu1 %v2457_v29, %s2641_s23  ;;  %2453 = vrot.lane.b32.xlu0 %v2452_v30, %s2641_s23 }
  0xf6   : > { %605 = vrot.lane.b32.xlu1 %v2771_v25, %s2642_s24  ;;  %607 = vrot.lane.b32.xlu0 %v2777_v27, %s2642_s24 }
  0xfa   : > { %609 = vrot.lane.b32.xlu1 %v2774_v26, %s2642_s24  ;;  %611 = vrot.lane.b32.xlu0 %v2780_v28, %s2642_s24 }
  0xfe   : > { %857 = vperm.xlu1 %2462, %v854_v31  }
 0x164   : > { %v2459_v32 = vpop.permute.xlu1 %2458  ;;  %v2454_v33 = vpop.permute.xlu0 %2453 }
 0x165   : > { %v2461_v34 = vunpack.i.h.bf16 %v2459_v32  ;;  %v2460_v35 = vunpack.i.l.bf16 %v2459_v32  ;;  %v2456_v36 = vunpack.i.h.bf16 %v2454_v33  ;;  %v2455_v37 = vunpack.i.l.bf16 %v2454_v33 }
 0x167   : > { %v2800_v38 = vsel %vm596_vm1, %v2460_v35, %v2461_v34  ;;  %v2803_v39 = vsel %vm596_vm1, %v2455_v37, %v2456_v36  ;;  %v2806_v40 = vsel %vm596_vm1, %v2456_v36, %v2460_v35  ;;  %v2809_v41 = vsel %vm596_vm1, %v2461_v34, %v2455_v37 }
 0x168   : > { %v2283_v42 = vpack.c.bf16 %v2774_v26, %v2800_v38  ;;  %v2279_v43 = vpack.c.bf16 %v2771_v25, %v2803_v39  ;;  %v606_v44 = vpop.permute.xlu1 %605  ;;  %v608_v45 = vpop.permute.xlu0 %607  ;;  %v2277_v46 = vpack.c.bf16 %v2777_v27, %v2806_v40  ;;  %v2281_v47 = vpack.c.bf16 %v2780_v28, %v2809_v41 }
 0x169   : > { %v2832_v54 = vsel %vm613_vm2, %v606_v44, %v608_v45 }
 0x16a   : > { %2278 = vmatprep.subr.bf16.mxu0 %v2277_v46  ;;  %2282 = vmatprep.subr.bf16.mxu1 %v2281_v47 }
 0x16b   : > { %2280 = vmatpush1.bf16.msra.mxu0 %v2279_v43  ;;  %2284 = vmatpush1.bf16.msra.mxu1 %v2283_v42 }
 0x16c   : > { %v610_v48 = vpop.permute.xlu1 %609  ;;  %v612_v49 = vpop.permute.xlu0 %611 }
 0x16d   : > { %v2820_v50 = vsel %vm613_vm2, %v610_v48, %v612_v49  ;;  %v2823_v51 = vsel %vm613_vm2, %v608_v45, %v610_v48  ;;  %v2826_v52 = vsel %vm613_vm2, %v612_v49, %v606_v44 }
 0x16e   : > { %640 = vmatprep.subr.mxu0 %v2823_v51  ;;  %723 = vmatprep.subr.mxu1 %v2826_v52 }
 0x16f   : > { %641 = vmatpush1.msra.mxu0 %v2832_v54  ;;  %724 = vmatpush1.msra.mxu1 %v2820_v50 }
 0x170   : > { %2237 = vmatmul.mubr.msk.f32.vlgmr.msra.gmra.mrb[2].mxu0 %vm626_vm3, %v623_v53  ;;  %2240 = vmatmul.mubr.msk.f32.vlgmr.msra.gmra.mrb[2].mxu1 %vm626_vm3, %v623_v53 }
 0x171   : > { %706 = vmatprep.mubr.f32.mxu0 %v3482_v1  ;;  %789 = vmatprep.mubr.f32.mxu1 %v3482_v1 }
 0x174   : > { %2238 = vmatmul.mubr.msk.f32.gmra.mrb[4].mxu0 %vm626_vm3, %v624_v55  ;;  %2241 = vmatmul.mubr.msk.f32.gmra.mrb[4].mxu1 %vm626_vm3, %v624_v55 }
 0x175   : > { %712 = vmatprep.mubr.f32.mxu0 %v3482_v1  ;;  %795 = vmatprep.mubr.f32.mxu1 %v3482_v1 }
 0x178   : > { %2239 = vmatmul.mubr.msk.f32.gmra.mrb[6].mxu0 %vm626_vm3, %v625_v56  ;;  %2242 = vmatmul.mubr.msk.f32.gmra.mrb[6].mxu1 %vm626_vm3, %v625_v56 }
 0x179   : > { %1065 = vmatprep.mubr.f32.mxu0 %v3482_v1  ;;  %1160 = vmatprep.mubr.f32.mxu1 %v3482_v1 }
 0x17d   : > { %v858_v7 = vpop.permute.xlu1 %857 }
 0x243   : > { %v702_v57 = vpop.f32.mrb[2].mxu0  ;;  %v785_v58 = vpop.f32.mrb[2].mxu1 }
 0x244   : > { %809 = vrot.lane.b32.xlu1 %v702_v57, %s2643_s17  ;;  %v704_v59 = vpop.f32.mrb[3].mxu0  ;;  %v787_v60 = vpop.f32.mrb[3].mxu1 }
 0x245   : > { %803 = vrot.lane.b32.xlu0 %v787_v60, %s2643_s17 }
 0x247   : > { %v708_v61 = vpop.f32.mrb[4].mxu0  ;;  %v791_v62 = vpop.f32.mrb[4].mxu1 }
 0x248   : > { %v710_v63 = vpop.f32.mrb[5].mxu0  ;;  %813 = vrot.lane.b32.xlu1 %v785_v58, %s2643_s17  ;;  %v793_v0 = vpop.f32.mrb[5].mxu1 }
 0x249   : > { %811 = vrot.lane.b32.xlu0 %v704_v59, %s2643_s17 }
 0x24b   : > { %v714_v2 = vpop.f32.mrb[6].mxu0  ;;  %v797_v3 = vpop.f32.mrb[6].mxu1 }
 0x24c   : > { %v716_v4 = vpop.f32.mrb[7].mxu0  ;;  %v799_v5 = vpop.f32.mrb[7].mxu1 }
 0x24d   : > { %834 = vrot.lane.b32.xlu1 %v716_v4, %s2644_s18  ;;  %832 = vrot.lane.b32.xlu0 %v714_v2, %s2644_s18  ;;  %v1293_v4 = vld [vmem:[%s3476_s7] sm:$0xff] }
 0x251   : > { %836 = vrot.lane.b32.xlu0 %v797_v3, %s2644_s18  ;;  %838 = vrot.lane.b32.xlu1 %v799_v5, %s2644_s18 }
 0x255   : > { %2464 = vrot.lane.b32.xlu1 %v2463_v6, %s2645_s19 }
 0x2b6   : > { %v810_v8 = vpop.permute.xlu1 %809 }
 0x2b7   : > { %v804_v9 = vpop.permute.xlu0 %803 }
 0x2b8   : > { %v823_v12 = vsel %vm815_vm4, %v804_v9, %v810_v8 }
 0x2b9   : > { %v824_v13 = vadd.f32 %v823_v12, %v708_v61 }
 0x2ba   : > { %v814_v10 = vpop.permute.xlu1 %813 }
 0x2bb   : > { %v812_v11 = vpop.permute.xlu0 %811  ;;  %v818_v18 = vsel %vm815_vm4, %v814_v10, %v804_v9 }
 0x2bc   : > { %v816_v19 = vsel %vm815_vm4, %v810_v8, %v812_v11  ;;  %v817_v20 = vsel %vm815_vm4, %v812_v11, %v814_v10  ;;  %v827_v29 = vadd.f32 %v818_v18, %v793_v0  ;;  %v2498_v0 = vpack.i.bf16 %v2780_v28, %v2774_v26 }
 0x2bd   : > { %v825_v30 = vadd.f32 %v816_v19, %v710_v63  ;;  %v826_v31 = vadd.f32 %v817_v20, %v791_v62 }
 0x2bf   : > { %v835_v14 = vpop.permute.xlu1 %834  ;;  %v833_v17 = vpop.permute.xlu0 %832 }
 0x2c0   : > { %v841_v23 = vsel %vm840_vm5, %v833_v17, %v835_v14 }
 0x2c1   : > { %v850_v24 = vadd.f32 %v841_v23, %v824_v13 }
 0x2c3   : > { %v837_v32 = vpop.permute.xlu0 %836  ;;  %v839_v33 = vpop.permute.xlu1 %838  ;;  %v860_v37 = vadd.f32 %v858_v7, %v850_v24 }
 0x2c4   : > { %v842_v34 = vsel %vm840_vm5, %v835_v14, %v837_v32  ;;  %v843_v35 = vsel %vm840_vm5, %v837_v32, %v839_v33  ;;  %v849_v36 = vsel %vm840_vm5, %v839_v33, %v833_v17 }
 0x2c5   : > { %v851_v42 = vadd.f32 %v842_v34, %v825_v30  ;;  %v852_v43 = vadd.f32 %v843_v35, %v826_v31  ;;  %v853_v44 = vadd.f32 %v849_v36, %v827_v29  ;;  %v864_v48 = vmax.f32 %v860_v37, 0.0 }
 0x2c7   : > { %v861_v45 = vadd.f32 %v858_v7, %v851_v42  ;;  %v862_v46 = vadd.f32 %v858_v7, %v852_v43  ;;  %v863_v47 = vadd.f32 %v858_v7, %v853_v44  ;;  %v2885_v59 = vmul.f32 %v864_v48, %v2753_v15  ;;  %v2465_v5 = vpop.permute.xlu1 %2464 }
 0x2c8   : > { %v2467_v8 = vunpack.i.h.bf16 %v2465_v5  ;;  %v2466_v9 = vunpack.i.l.bf16 %v2465_v5 }
 0x2c9   : > { %v865_v49 = vmax.f32 %v861_v45, 0.0  ;;  %v866_v53 = vmax.f32 %v862_v46, 0.0  ;;  %v867_v55 = vmax.f32 %v863_v47, 0.0  ;;  %v2473_v62 = vpack.i.bf16 %v2885_v59, %v2774_v26 }
 0x2ca   : > { %v895_v20 = vsel %vm894_vm6, %v2466_v9, %v2467_v8 }
 0x2cb   : > { %v2876_v56 = vmul.f32 %v865_v49, %v2763_v21  ;;  %v2879_v57 = vmul.f32 %v866_v53, %v2758_v16  ;;  %v2882_v58 = vmul.f32 %v867_v55, %v2768_v22 }
 0x2cd   : > { %v2468_v60 = vpack.i.bf16 %v2882_v58, %v2780_v28  ;;  %v2478_v61 = vpack.i.bf16 %v2879_v57, %v2876_v56  ;;  %v2483_v63 = vpack.i.bf16 %v2885_v59, %v2882_v58  ;;  %v2905_v2 = vpack.i.bf16 %v2882_v58, %v2879_v57 }
 0x2ce   : > { %v2912_v3 = vpack.i.bf16 %v2876_v56, %v2885_v59 }
 0x2cf   : > { %2469 = vrot.lane.b32.xlu0 %v2468_v60, %s2645_s19  ;;  %2479 = vrot.lane.b32.xlu1 %v2478_v61, %s2645_s19 }
 0x2d3   : > { %2474 = vrot.lane.b32.xlu0 %v2473_v62, %s2645_s19  ;;  %2494 = vrot.lane.b32.xlu1 %v2478_v61, %s2641_s23 }
 0x2d7   : > { %2484 = vrot.lane.b32.xlu0 %v2483_v63, %s2641_s23  ;;  %2499 = vrot.lane.b32.xlu1 %v2498_v0, %s2646_s20  ;;  %v2972_v0 = vpack.c.bf16 %v2876_v56, %v2777_v27 }
 0x2db   : > { %2489 = vrot.lane.b32.xlu0 %v2463_v6, %s2646_s20  ;;  %2509 = vrot.lane.b32.xlu1 %v2905_v2, %s2642_s24 }
 0x2df   : > { %2504 = vrot.lane.b32.xlu0 %v2912_v3, %s2642_s24  ;;  %2519 = vrot.lane.b32.xlu1 %v2905_v2, %s2646_s20 }
 0x2e3   : > { %2514 = vrot.lane.b32.xlu0 %v2912_v3, %s2646_s20 }
 0x2e7   : > { %1296 = vperm.xlu0 %2451, %v1293_v4  }
 0x341   : > { %v2470_v6 = vpop.permute.xlu0 %2469  ;;  %v2480_v7 = vpop.permute.xlu1 %2479 }
 0x342   : > { %v2471_v10 = vunpack.i.l.bf16 %v2470_v6  ;;  %v2482_v11 = vunpack.i.h.bf16 %v2480_v7  ;;  %v2481_v12 = vunpack.i.l.bf16 %v2480_v7  ;;  %v2472_v17 = vunpack.i.h.bf16 %v2470_v6 }
 0x344   : > { %v909_v23 = vsel %vm894_vm6, %v2471_v10, %v2466_v9  ;;  %v2933_v31 = vsel %vm894_vm6, %v2481_v12, %v2482_v11  ;;  %v2942_v46 = vsel %vm894_vm6, %v2482_v11, %v2472_v17  ;;  %v2987_v9 = vpack.c.bf16 %v2882_v58, %v2780_v28 }
 0x345   : > { %v2475_v13 = vpop.permute.xlu0 %2474  ;;  %v2495_v14 = vpop.permute.xlu1 %2494 }
 0x346   : > { %v2477_v18 = vunpack.i.h.bf16 %v2475_v13  ;;  %v2476_v19 = vunpack.i.l.bf16 %v2475_v13  ;;  %v2497_v36 = vunpack.i.h.bf16 %v2495_v14  ;;  %v2496_v37 = vunpack.i.l.bf16 %v2495_v14 }
 0x348   : > { %v896_v24 = vsel %vm894_vm6, %v2467_v8, %v2476_v19  ;;  %v2927_v29 = vsel %vm894_vm6, %v2472_v17, %v2477_v18  ;;  %v2930_v30 = vsel %vm894_vm6, %v2477_v18, %v2481_v12  ;;  %v897_v45 = vsel %vm894_vm6, %v2476_v19, %v2471_v10 }
 0x349   : > { %v2287_v32 = vpack.c.bf16 %v2927_v29, %v909_v23  ;;  %v2485_v33 = vpop.permute.xlu0 %2484  ;;  %v2936_v34 = vpop.permute.xlu1 %2499  ;;  %v2285_v35 = vpack.c.bf16 %v2930_v30, %v895_v20  ;;  %v2307_v44 = vpack.c.bf16 %v2933_v31, %v896_v24  ;;  %v2305_v48 = vpack.c.bf16 %v2942_v46, %v897_v45 }
 0x34a   : > { %v2487_v42 = vunpack.i.h.bf16 %v2485_v33  ;;  %v2486_v43 = vunpack.i.l.bf16 %v2485_v33  ;;  %v2963_v63 = vsel %vm596_vm1, %v2496_v37, %v2497_v36  ;;  %v2993_v12 = vpack.c.bf16 %v2879_v57, %v2774_v26 }
 0x34b   : > { %2286 = vmatprep.subr.bf16.mxu0 %v2285_v35  ;;  %2306 = vmatprep.subr.bf16.mxu1 %v2305_v48  ;;  %v2977_v5 = vpack.c.bf16 %v2963_v63, %v2800_v38  ;;  %v2502_v38 = vunpack.i.h.bf16 %v2936_v34 }
 0x34c   : > { %v2945_v47 = vsel %vm596_vm1, %v2486_v43, %v2487_v42  ;;  %2288 = vmatpush1.bf16.msra.mxu0 %v2287_v32  ;;  %v2949_v49 = vsel %vm596_vm1, %v2487_v42, %v2496_v37  ;;  %v2960_v62 = vsel %vm596_vm1, %v2497_v36, %v2486_v43  ;;  %2308 = vmatpush1.bf16.msra.mxu1 %v2307_v44 }
 0x34d   : > { %v2953_v53 = vpack.c.bf16 %v2945_v47, %v2803_v39  ;;  %v2490_v55 = vpop.permute.xlu0 %2489  ;;  %v2510_v60 = vpop.permute.xlu1 %2509  ;;  %v2957_v61 = vpack.c.bf16 %v2949_v49, %v2806_v40  ;;  %v2968_v39 = vpack.c.bf16 %v2960_v62, %v2809_v41  ;;  %v2983_v41 = vpack.c.bf16 %v2885_v59, %v2771_v25  ;;  %3489 = vst [vmem:[#allocation2_spill] sm:$0xff] %v2993_v12 }
 0x34e   : > { %v2512_v40 = vunpack.i.h.bf16 %v2510_v60  ;;  %v2511_v4 = vunpack.i.l.bf16 %v2510_v60  ;;  %v2492_v10 = vunpack.i.h.bf16 %v2490_v55  ;;  %v2491_v11 = vunpack.i.l.bf16 %v2490_v55  ;;  %v981_v60 = vld [vmem:[%s3475_s6 + $0x8] sm:$0xff] }
 0x34f   : > { %2290 = vmatprep.subr.bf16.mxu0 %v2957_v61  ;;  %2310 = vmatprep.subr.bf16.mxu1 %v2968_v39  ;;  %v2501_v25 = vunpack.i.l.bf16 %v2936_v34 }
 0x350   : > { %2292 = vmatpush1.bf16.msra.mxu0 %v2953_v53  ;;  %2312 = vmatpush1.bf16.msra.mxu1 %v2977_v5  ;;  %v2997_v13 = vsel %vm613_vm2, %v2511_v4, %v2512_v40  ;;  %v962_v34 = vsel %vm961_vm7, %v2491_v11, %v2492_v10 }
 0x351   : > { %v2505_v6 = vpop.permute.xlu0 %2504  ;;  %2294 = vmatprep.subr.bf16.mxu0 %v2972_v0  ;;  %v2520_v8 = vpop.permute.xlu1 %2519  ;;  %2314 = vmatprep.subr.bf16.mxu1 %v2987_v9  ;;  %v3040_v37 = vpack.c.bf16 %v2997_v13, %v2820_v50  ;;  %v964_v48 = vsel %vm961_vm7, %v2501_v25, %v2502_v38  ;;  %v980_v50 = vld [vmem:[%s3475_s6] sm:$0xff] }
 0x352   : > { %v2507_v27 = vunpack.i.h.bf16 %v2505_v6  ;;  %v2506_v7 = vunpack.i.l.bf16 %v2505_v6  ;;  %v2522_v26 = vunpack.i.h.bf16 %v2520_v8  ;;  %v2521_v23 = vunpack.i.l.bf16 %v2520_v8  ;;  %v984_v6 = vld [vmem:[%s3475_s6 + $0x20] sm:$0xff] }
 0x353   : > { %3493 = vst [vmem:[#allocation6_spill] sm:$0xff] %v3040_v37 }
 0x354   : > { %v3000_v14 = vsel %vm613_vm2, %v2506_v7, %v2507_v27  ;;  %2296 = vmatpush1.bf16.msra.mxu0 %v2983_v41  ;;  %v3005_v28 = vsel %vm613_vm2, %v2507_v27, %v2511_v4  ;;  %v3016_v20 = vsel %vm613_vm2, %v2512_v40, %v2506_v7  ;;  %2316 = vmatpush1.bf16.msra.mxu1 %v2993_v12  ;;  %v982_v40 = vld [vmem:[%s3475_s6 + $0x10] sm:$0xff]  ;;  %v983_v4 = vld [vmem:[%s3475_s6 + $0x18] sm:$0xff] }
 0x355   : > { %v3009_v17 = vpack.c.bf16 %v3000_v14, %v2832_v54  ;;  %v2515_v18 = vpop.permute.xlu0 %2514  ;;  %v3013_v19 = vpack.c.bf16 %v3005_v28, %v2823_v51  ;;  %v3020_v33 = vpack.c.bf16 %v3016_v20, %v2826_v52  ;;  %v963_v54 = vsel %vm961_vm7, %v2492_v10, %v2501_v25 }
 0x356   : > { %v2517_v24 = vunpack.i.h.bf16 %v2515_v18  ;;  %v2516_v32 = vunpack.i.l.bf16 %v2515_v18  ;;  %v978_v51 = vsel %vm961_vm7, %v2502_v38, %v2491_v11  ;;  %v3046_v45 = vsel %vm961_vm7, %v2521_v23, %v2522_v26 }
 0x357   : > { %3490 = vst [vmem:[#allocation3_spill] sm:$0xff] %v3009_v17  ;;  %3491 = vst [vmem:[#allocation4_spill] sm:$0xff] %v3013_v19  ;;  %2298 = vmatprep.subr.bf16.mxu0 %v3013_v19  ;;  %2318 = vmatprep.subr.bf16.mxu1 %v3020_v33  ;;  %v2323_v55 = vpack.c.bf16 %v3046_v45, %v964_v48 }
 0x358   : > { %3492 = vst [vmem:[#allocation5_spill] sm:$0xff] %v3020_v33  ;;  %v3028_v35 = vsel %vm961_vm7, %v2516_v32, %v2517_v24  ;;  %2300 = vmatpush1.bf16.msra.mxu0 %v3009_v17  ;;  %v3033_v52 = vsel %vm961_vm7, %v2517_v24, %v2521_v23  ;;  %v3036_v36 = vsel %vm961_vm7, %v2522_v26, %v2516_v32 }
 0x359   : > { %v2303_v42 = vpack.c.bf16 %v3028_v35, %v962_v34  ;;  %v2301_v43 = vpack.c.bf16 %v3033_v52, %v963_v54  ;;  %v2321_v44 = vpack.c.bf16 %v3036_v36, %v978_v51  ;;  %2320 = vmatpush1.bf16.msra.mxu1 %v3040_v37 }
 0x35b   : > { %2302 = vmatprep.subr.bf16.mxu0 %v2301_v43  ;;  %2322 = vmatprep.subr.bf16.mxu1 %v2321_v44 }
 0x35c   : > { %2304 = vmatpush1.bf16.msra.mxu0 %v2303_v42 }
 0x35d   : > { %2324 = vmatpush1.bf16.msra.mxu1 %v2323_v55 }
 0x35f   : > { %2243 = vmatmul.mubr.msk.f32.vlgmr.msra.gmra.mrb[8].mxu0 %vm985_vm8, %v980_v50 }
 0x360   : > { %1071 = vmatprep.mubr.f32.mxu0 %v3482_v1  ;;  %2248 = vmatmul.mubr.msk.f32.vlgmr.msra.gmra.mrb[8].mxu1 %vm985_vm8, %v980_v50 }
 0x361   : > { %1166 = vmatprep.mubr.f32.mxu1 %v3482_v1 }
 0x363   : > { %2244 = vmatmul.mubr.msk.f32.gmra.mrb[10].mxu0 %vm985_vm8, %v981_v60 }
 0x364   : > { %1077 = vmatprep.mubr.f32.mxu0 %v3482_v1  ;;  %2249 = vmatmul.mubr.msk.f32.gmra.mrb[10].mxu1 %vm985_vm8, %v981_v60 }
 0x365   : > { %1172 = vmatprep.mubr.f32.mxu1 %v3482_v1 }
 0x366   : > { %v1297_v55 = vpop.permute.xlu0 %1296 }
 0x367   : > { %2245 = vmatmul.mubr.msk.f32.gmra.mrb[12].mxu0 %vm985_vm8, %v982_v40 }
 0x368   : > { %1083 = vmatprep.mubr.f32.mxu0 %v3482_v1  ;;  %2250 = vmatmul.mubr.msk.f32.gmra.mrb[12].mxu1 %vm985_vm8, %v982_v40 }
 0x369   : > { %1178 = vmatprep.mubr.f32.mxu1 %v3482_v1 }
 0x36b   : > { %2246 = vmatmul.mubr.msk.f32.gmra.mrb[14].mxu0 %vm985_vm8, %v983_v4 }
 0x36c   : > { %1089 = vmatprep.mubr.f32.mxu0 %v3482_v1  ;;  %2251 = vmatmul.mubr.msk.f32.gmra.mrb[14].mxu1 %vm985_vm8, %v983_v4 }
 0x36d   : > { %1184 = vmatprep.mubr.f32.mxu1 %v3482_v1 }
 0x36f   : > { %2247 = vmatmul.mubr.msk.f32.gmra.mrb[16].mxu0 %vm985_vm8, %v984_v6 }
 0x370   : > { %1546 = vmatprep.mubr.f32.mxu0 %v3482_v1  ;;  %2252 = vmatmul.mubr.msk.f32.gmra.mrb[16].mxu1 %vm985_vm8, %v984_v6 }
 0x371   : > { %1653 = vmatprep.mubr.f32.mxu1 %v3482_v1 }
 0x432   : > { %v1067_v27 = vpop.f32.mrb[8].mxu0 }
 0x433   : > { %1198 = vrot.lane.b32.xlu1 %v1067_v27, %s2647_s13  ;;  %v1069_v7 = vpop.f32.mrb[9].mxu0  ;;  %v1162_v8 = vpop.f32.mrb[8].mxu1 }
 0x434   : > { %v1164_v38 = vpop.f32.mrb[9].mxu1 }
 0x435   : > { %1192 = vrot.lane.b32.xlu0 %v1164_v38, %s2647_s13 }
 0x436   : > { %v1073_v10 = vpop.f32.mrb[10].mxu0 }
 0x437   : > { %1202 = vrot.lane.b32.xlu1 %v1162_v8, %s2647_s13  ;;  %v1075_v11 = vpop.f32.mrb[11].mxu0  ;;  %v1168_v25 = vpop.f32.mrb[10].mxu1 }
 0x438   : > { %v1170_v26 = vpop.f32.mrb[11].mxu1 }
 0x439   : > { %1200 = vrot.lane.b32.xlu0 %v1069_v7, %s2647_s13 }
 0x43a   : > { %v1079_v18 = vpop.f32.mrb[12].mxu0 }
 0x43b   : > { %1220 = vrot.lane.b32.xlu1 %v1073_v10, %s2643_s17  ;;  %v1081_v23 = vpop.f32.mrb[13].mxu0  ;;  %v3091_v24 = vpop.f32.mrb[12].mxu1 }
 0x43c   : > { %v3093_v34 = vpop.f32.mrb[13].mxu1 }
 0x43d   : > { %1214 = vrot.lane.b32.xlu0 %v1170_v26, %s2643_s17 }
 0x43e   : > { %v1085_v32 = vpop.f32.mrb[14].mxu0 }
 0x43f   : > { %1224 = vrot.lane.b32.xlu1 %v1168_v25, %s2643_s17  ;;  %v1087_v54 = vpop.f32.mrb[15].mxu0  ;;  %v1180_v51 = vpop.f32.mrb[14].mxu1 }
 0x440   : > { %v1182_v42 = vpop.f32.mrb[15].mxu1 }
 0x441   : > { %1222 = vrot.lane.b32.xlu0 %v1075_v11, %s2643_s17 }
 0x442   : > { %v1091_v43 = vpop.f32.mrb[16].mxu0 }
 0x443   : > { %1246 = vrot.lane.b32.xlu1 %v1085_v32, %s2644_s18  ;;  %v1093_v44 = vpop.f32.mrb[17].mxu0  ;;  %v1186_v48 = vpop.f32.mrb[16].mxu1 }
 0x444   : > { %v1188_v50 = vpop.f32.mrb[17].mxu1 }
 0x445   : > { %1248 = vrot.lane.b32.xlu0 %v1087_v54, %s2644_s18 }
 0x447   : > { %1250 = vrot.lane.b32.xlu1 %v1180_v51, %s2644_s18 }
 0x449   : > { %1252 = vrot.lane.b32.xlu0 %v1182_v42, %s2644_s18 }
 0x44b   : > { %1271 = vrot.lane.b32.xlu1 %v1091_v43, %s2648_s14 }
 0x44d   : > { %1273 = vrot.lane.b32.xlu0 %v1093_v44, %s2648_s14 }
 0x44f   : > { %1275 = vrot.lane.b32.xlu1 %v1186_v48, %s2648_s14 }
 0x451   : > { %1277 = vrot.lane.b32.xlu0 %v1188_v50, %s2648_s14 }
 0x455   : > { %2524 = vrot.lane.b32.xlu0 %v2912_v3, %s2649_s15 }
 0x4a5   : > { %v1199_v60 = vpop.permute.xlu1 %1198 }
 0x4a7   : > { %v1193_v40 = vpop.permute.xlu0 %1192 }
 0x4a8   : > { %v1212_v54 = vsel %vm1204_vm9, %v1193_v40, %v1199_v60 }
 0x4a9   : > { %v1203_v4 = vpop.permute.xlu1 %1202 }
 0x4aa   : > { %v1207_v37 = vsel %vm1204_vm9, %v1203_v4, %v1193_v40 }
 0x4ab   : > { %v1201_v6 = vpop.permute.xlu0 %1200 }
 0x4ac   : > { %v1205_v51 = vsel %vm1204_vm9, %v1199_v60, %v1201_v6  ;;  %v1206_v17 = vsel %vm1204_vm9, %v1201_v6, %v1203_v4 }
 0x4ad   : > { %v1221_v27 = vpop.permute.xlu1 %1220 }
 0x4af   : > { %v1215_v7 = vpop.permute.xlu0 %1214 }
 0x4b0   : > { %v1233_v11 = vsel %vm815_vm4, %v1215_v7, %v1221_v27 }
 0x4b1   : > { %v1225_v8 = vpop.permute.xlu1 %1224  ;;  %v1234_v42 = vadd.f32 %v1233_v11, %v1212_v54 }
 0x4b2   : > { %v1228_v44 = vsel %vm815_vm4, %v1225_v8, %v1215_v7 }
 0x4b3   : > { %v1223_v38 = vpop.permute.xlu0 %1222  ;;  %v1237_v19 = vadd.f32 %v1228_v44, %v1207_v37  ;;  %v1238_v60 = vadd.f32 %v1234_v42, %v1079_v18 }
 0x4b4   : > { %v1226_v25 = vsel %vm815_vm4, %v1221_v27, %v1223_v38  ;;  %v1227_v48 = vsel %vm815_vm4, %v1223_v38, %v1225_v8 }
 0x4b5   : > { %v1247_v10 = vpop.permute.xlu1 %1246  ;;  %v1235_v43 = vadd.f32 %v1226_v25, %v1205_v51  ;;  %v1236_v12 = vadd.f32 %v1227_v48, %v1206_v17 }
 0x4b7   : > { %v1249_v26 = vpop.permute.xlu0 %1248  ;;  %v1239_v11 = vadd.f32 %v1235_v43, %v1081_v23  ;;  %v1240_v6 = vadd.f32 %v1236_v12, %v3091_v24 }
 0x4b8   : > { %v1254_v27 = vsel %vm840_vm5, %v1247_v10, %v1249_v26 }
 0x4b9   : > { %v1251_v32 = vpop.permute.xlu1 %1250  ;;  %v1263_v25 = vadd.f32 %v1254_v27, %v1238_v60 }
 0x4ba   : > { %v1255_v33 = vsel %vm840_vm5, %v1249_v26, %v1251_v32  ;;  %v1241_v26 = vadd.f32 %v1237_v19, %v3093_v34 }
 0x4bb   : > { %v1253_v50 = vpop.permute.xlu0 %1252  ;;  %v1264_v54 = vadd.f32 %v1255_v33, %v1239_v11 }
 0x4bc   : > { %v1256_v8 = vsel %vm840_vm5, %v1251_v32, %v1253_v50  ;;  %v1262_v38 = vsel %vm840_vm5, %v1253_v50, %v1247_v10 }
 0x4bd   : > { %v1272_v1 = vpop.permute.xlu1 %1271  ;;  %v1265_v18 = vadd.f32 %v1256_v8, %v1240_v6  ;;  %v1266_v23 = vadd.f32 %v1262_v38, %v1241_v26 }
 0x4bf   : > { %v1274_v7 = vpop.permute.xlu0 %1273 }
 0x4c0   : > { %v1280_v40 = vsel %vm1279_vm10, %v1272_v1, %v1274_v7 }
 0x4c1   : > { %v1276_v51 = vpop.permute.xlu1 %1275  ;;  %v1289_v37 = vadd.f32 %v1280_v40, %v1263_v25 }
 0x4c2   : > { %v1281_v4 = vsel %vm1279_vm10, %v1274_v7, %v1276_v51 }
 0x4c3   : > { %v1290_v17 = vadd.f32 %v1281_v4, %v1264_v54  ;;  %v1278_v33 = vpop.permute.xlu0 %1277  ;;  %v1299_v44 = vadd.f32 %v1297_v55, %v1289_v37 }
 0x4c4   : > { %v1282_v43 = vsel %vm1279_vm10, %v1276_v51, %v1278_v33  ;;  %v1288_v32 = vsel %vm1279_vm10, %v1278_v33, %v1272_v1 }
 0x4c5   : > { %v1300_v42 = vadd.f32 %v1297_v55, %v1290_v17  ;;  %v1291_v48 = vadd.f32 %v1282_v43, %v1265_v18  ;;  %v1292_v50 = vadd.f32 %v1288_v32, %v1266_v23  ;;  %v1303_v11 = vmax.f32 %v1299_v44, 0.0 }
 0x4c7   : > { %v1304_v10 = vmax.f32 %v1300_v42, 0.0  ;;  %v1301_v27 = vadd.f32 %v1297_v55, %v1291_v48  ;;  %v1302_v60 = vadd.f32 %v1297_v55, %v1292_v50  ;;  %v3136_v1 = vmul.f32 %v1303_v11, %v2753_v15  ;;  %v2525_v7 = vpop.permute.xlu0 %2524 }
 0x4c8   : > { %v2527_v8 = vunpack.i.h.bf16 %v2525_v7  ;;  %v2526_v38 = vunpack.i.l.bf16 %v2525_v7 }
 0x4c9   : > { %v3127_v12 = vmul.f32 %v1304_v10, %v2763_v21  ;;  %v1305_v19 = vmax.f32 %v1301_v27, 0.0  ;;  %v1306_v24 = vmax.f32 %v1302_v60, 0.0 }
 0x4ca   : > { %v1334_v42 = vsel %vm1333_vm11, %v2526_v38, %v2527_v8 }
 0x4cb   : > { %v3130_v34 = vmul.f32 %v1305_v19, %v2758_v16  ;;  %v3133_v25 = vmul.f32 %v1306_v24, %v2768_v22  ;;  %v2533_v16 = vpack.i.bf16 %v3136_v1, %v2879_v57  ;;  %v2573_v22 = vpack.i.bf16 %v3127_v12, %v3136_v1 }
 0x4cd   : > { %v2528_v54 = vpack.i.bf16 %v3133_v25, %v2882_v58  ;;  %v2538_v55 = vpack.i.bf16 %v3130_v34, %v3127_v12  ;;  %v2543_v15 = vpack.i.bf16 %v3136_v1, %v3133_v25  ;;  %v2578_v21 = vpack.i.bf16 %v3133_v25, %v3130_v34 }
 0x4cf   : > { %2529 = vrot.lane.b32.xlu1 %v2528_v54, %s2649_s15  ;;  %2539 = vrot.lane.b32.xlu0 %v2538_v55, %s2649_s15 }
 0x4d3   : > { %2534 = vrot.lane.b32.xlu1 %v2533_v16, %s2649_s15  ;;  %2549 = vrot.lane.b32.xlu0 %v2538_v55, %s2645_s19 }
 0x4d7   : > { %2544 = vrot.lane.b32.xlu1 %v2543_v15, %s2645_s19  ;;  %2564 = vrot.lane.b32.xlu0 %v2538_v55, %s2641_s23  ;;  %s2651_s19 = smov 3  }
 0x4db   : > { %2554 = vrot.lane.b32.xlu1 %v2543_v15, %s2641_s23  ;;  %2569 = vrot.lane.b32.xlu0 %v2905_v2, %s2650_s16  ;;  %v1848_v2 = vld [vmem:[%s3478_s9] sm:$0xff] }
 0x4df   : > { %2559 = vrot.lane.b32.xlu1 %v2912_v3, %s2650_s16  ;;  %2579 = vrot.lane.b32.xlu0 %v2578_v21, %s2642_s24 }
 0x4e3   : > { %2574 = vrot.lane.b32.xlu1 %v2573_v22, %s2642_s24  ;;  %2589 = vrot.lane.b32.xlu0 %v2578_v21, %s2646_s20 }
 0x4e7   : > { %2584 = vrot.lane.b32.xlu1 %v2573_v22, %s2646_s20  ;;  %2599 = vrot.lane.b32.xlu0 %v2578_v21, %s2650_s16 }
 0x4eb   : > { %2594 = vrot.lane.b32.xlu1 %v2573_v22, %s2650_s16 }
 0x4ef   : > { %1851 = vperm.xlu1 %2462, %v1848_v2  }
 0x541   : > { %v2530_v3 = vpop.permute.xlu1 %2529  ;;  %v2540_v51 = vpop.permute.xlu0 %2539 }
 0x542   : > { %v2531_v40 = vunpack.i.l.bf16 %v2530_v3  ;;  %v2532_v4 = vunpack.i.h.bf16 %v2530_v3  ;;  %v2542_v37 = vunpack.i.h.bf16 %v2540_v51  ;;  %v2541_v17 = vunpack.i.l.bf16 %v2540_v51 }
 0x544   : > { %v1348_v33 = vsel %vm1333_vm11, %v2531_v40, %v2526_v38  ;;  %v1338_v19 = vsel %vm1333_vm11, %v2541_v17, %v2542_v37  ;;  %v1339_v15 = vsel %vm1333_vm11, %v2542_v37, %v2532_v4 }
 0x545   : > { %v2535_v6 = vpop.permute.xlu1 %2534  ;;  %v2550_v26 = vpop.permute.xlu0 %2549 }
 0x546   : > { %v2537_v18 = vunpack.i.h.bf16 %v2535_v6  ;;  %v2536_v23 = vunpack.i.l.bf16 %v2535_v6  ;;  %v2552_v48 = vunpack.i.h.bf16 %v2550_v26  ;;  %v2551_v50 = vunpack.i.l.bf16 %v2550_v26 }
 0x548   : > { %v1335_v43 = vsel %vm1333_vm11, %v2527_v8, %v2536_v23  ;;  %v1349_v32 = vsel %vm1333_vm11, %v2532_v4, %v2537_v18  ;;  %v1337_v44 = vsel %vm1333_vm11, %v2537_v18, %v2541_v17  ;;  %v1336_v16 = vsel %vm1333_vm11, %v2536_v23, %v2531_v40 }
 0x549   : > { %v2327_v10 = vpack.c.bf16 %v1349_v32, %v1348_v33  ;;  %v2545_v27 = vpop.permute.xlu1 %2544  ;;  %v2565_v60 = vpop.permute.xlu0 %2564  ;;  %v2325_v11 = vpack.c.bf16 %v1337_v44, %v1334_v42  ;;  %v2355_v55 = vpack.c.bf16 %v1338_v19, %v1335_v43  ;;  %v2353_v22 = vpack.c.bf16 %v1339_v15, %v1336_v16 }
 0x54a   : > { %v2547_v24 = vunpack.i.h.bf16 %v2545_v27  ;;  %v2546_v54 = vunpack.i.l.bf16 %v2545_v27  ;;  %v1360_v7 = vsel %vm894_vm6, %v2551_v50, %v2552_v48  ;;  %v2567_v40 = vunpack.i.h.bf16 %v2565_v60 }
 0x54b   : > { %2326 = vmatprep.subr.bf16.mxu0 %v2325_v11  ;;  %v2566_v26 = vunpack.i.l.bf16 %v2565_v60  ;;  %2354 = vmatprep.subr.bf16.mxu1 %v2353_v22  ;;  %v2359_v23 = vpack.c.bf16 %v1360_v7, %v2933_v31  ;;  %v2337_v31 = vpack.c.bf16 %v3127_v12, %v2876_v56  ;;  %v2365_v60 = vpack.c.bf16 %v3133_v25, %v2882_v58 }
 0x54c   : > { %v1366_v21 = vsel %vm894_vm6, %v2546_v54, %v2547_v24  ;;  %2328 = vmatpush1.bf16.msra.mxu0 %v2327_v10  ;;  %v1359_v2 = vsel %vm894_vm6, %v2547_v24, %v2551_v50  ;;  %v1361_v6 = vsel %vm894_vm6, %v2552_v48, %v2546_v54  ;;  %2356 = vmatpush1.bf16.msra.mxu1 %v2355_v55 }
 0x54d   : > { %v2331_v3 = vpack.c.bf16 %v1366_v21, %v2927_v29  ;;  %v2555_v51 = vpop.permute.xlu1 %2554  ;;  %v3178_v8 = vpop.permute.xlu0 %2569  ;;  %v2329_v38 = vpack.c.bf16 %v1359_v2, %v2930_v30  ;;  %v2357_v17 = vpack.c.bf16 %v1361_v6, %v2942_v46  ;;  %v3202_v44 = vsel %vm596_vm1, %v2566_v26, %v2567_v40 }
 0x54e   : > { %v2557_v4 = vunpack.i.h.bf16 %v2555_v51  ;;  %v2556_v37 = vunpack.i.l.bf16 %v2555_v51  ;;  %v2363_v48 = vpack.c.bf16 %v3202_v44, %v2963_v63  ;;  %v2339_v11 = vpack.c.bf16 %v3136_v1, %v2885_v59 }
 0x54f   : > { %2330 = vmatprep.subr.bf16.mxu0 %v2329_v38  ;;  %2358 = vmatprep.subr.bf16.mxu1 %v2357_v17  ;;  %v2367_v56 = vpack.c.bf16 %v3130_v34, %v2879_v57  ;;  %v2572_v15 = vunpack.i.h.bf16 %v3178_v8  ;;  %v2571_v2 = vunpack.i.l.bf16 %v3178_v8 }
 0x550   : > { %v3184_v18 = vsel %vm596_vm1, %v2556_v37, %v2557_v4  ;;  %2332 = vmatpush1.bf16.msra.mxu0 %v2331_v3  ;;  %v3187_v29 = vsel %vm596_vm1, %v2557_v4, %v2566_v26  ;;  %v3190_v30 = vsel %vm596_vm1, %v2567_v40, %v2556_v37  ;;  %2360 = vmatpush1.bf16.msra.mxu1 %v2359_v23 }
 0x551   : > { %v2335_v42 = vpack.c.bf16 %v3184_v18, %v2945_v47  ;;  %v3195_v33 = vpop.permute.xlu1 %2559  ;;  %v2580_v43 = vpop.permute.xlu0 %2579  ;;  %v2333_v46 = vpack.c.bf16 %v3187_v29, %v2949_v49  ;;  %v2361_v32 = vpack.c.bf16 %v3190_v30, %v2960_v62 }
 0x552   : > { %v2582_v10 = vunpack.i.h.bf16 %v2580_v43  ;;  %v2581_v47 = vunpack.i.l.bf16 %v2580_v43  ;;  %v2562_v7 = vunpack.i.h.bf16 %v3195_v33  ;;  %v2561_v3 = vunpack.i.l.bf16 %v3195_v33 }
 0x553   : > { %2334 = vmatprep.subr.bf16.mxu0 %v2333_v46  ;;  %2362 = vmatprep.subr.bf16.mxu1 %v2361_v32 }
 0x554   : > { %2336 = vmatpush1.bf16.msra.mxu0 %v2335_v42  ;;  %2364 = vmatpush1.bf16.msra.mxu1 %v2363_v48  ;;  %v3215_v19 = vsel %vm613_vm2, %v2581_v47, %v2582_v10  ;;  %v1435_v33 = vsel %vm1434_vm12, %v2561_v3, %v2562_v7  ;;  %v1436_v43 = vsel %vm1434_vm12, %v2562_v7, %v2571_v2 }
 0x555   : > { %v2575_v50 = vpop.permute.xlu1 %2574  ;;  %v2590_v49 = vpop.permute.xlu0 %2589  ;;  %2338 = vmatprep.subr.bf16.mxu0 %v2337_v31  ;;  %2366 = vmatprep.subr.bf16.mxu1 %v2365_v60  ;;  %v2371_v51 = vpack.c.bf16 %v3215_v19, %v2997_v13  ;;  %v1451_v46 = vsel %vm1434_vm12, %v2572_v15, %v2561_v3  ;;  %v1459_v60 = vld [vmem:[%s3477_s8 + $0x30] sm:$0xff] }
 0x556   : > { %v2577_v27 = vunpack.i.h.bf16 %v2575_v50  ;;  %v2576_v62 = vunpack.i.l.bf16 %v2575_v50  ;;  %v2592_v24 = vunpack.i.h.bf16 %v2590_v49  ;;  %v2591_v59 = vunpack.i.l.bf16 %v2590_v49  ;;  %v1453_v49 = vld [vmem:[%s3477_s8] sm:$0xff] }
 0x557   : > { %v1437_v50 = vsel %vm1434_vm12, %v2571_v2, %v2572_v15 }
 0x558   : > { %v3218_v63 = vsel %vm613_vm2, %v2576_v62, %v2577_v27  ;;  %2340 = vmatpush1.bf16.msra.mxu0 %v2339_v11  ;;  %v3221_v54 = vsel %vm613_vm2, %v2577_v27, %v2581_v47  ;;  %v3228_v16 = vsel %vm613_vm2, %v2582_v10, %v2576_v62  ;;  %2368 = vmatpush1.bf16.msra.mxu1 %v2367_v56  ;;  %v1454_v62 = vld [vmem:[%s3477_s8 + $0x8] sm:$0xff] }
 0x559   : > { %v2343_v58 = vpack.c.bf16 %v3218_v63, %v3000_v14  ;;  %v2585_v55 = vpop.permute.xlu1 %2584  ;;  %v2341_v57 = vpack.c.bf16 %v3221_v54, %v3005_v28  ;;  %v2600_v14 = vpop.permute.xlu0 %2599  ;;  %v2369_v28 = vpack.c.bf16 %v3228_v16, %v3016_v20  ;;  %v1411_v40 = vsel %vm961_vm7, %v2591_v59, %v2592_v24 }
 0x55a   : > { %v2587_v21 = vunpack.i.h.bf16 %v2585_v55  ;;  %v2586_v22 = vunpack.i.l.bf16 %v2585_v55  ;;  %v2602_v17 = vunpack.i.h.bf16 %v2600_v14  ;;  %v2601_v23 = vunpack.i.l.bf16 %v2600_v14 }
 0x55b   : > { %2342 = vmatprep.subr.bf16.mxu0 %v2341_v57  ;;  %2370 = vmatprep.subr.bf16.mxu1 %v2369_v28  ;;  %v2375_v32 = vpack.c.bf16 %v1411_v40, %v3046_v45  ;;  %v3494_v45 = vmov 0.0  }
 0x55c   : > { %v1409_v38 = vsel %vm961_vm7, %v2586_v22, %v2587_v21  ;;  %2344 = vmatpush1.bf16.msra.mxu0 %v2343_v58  ;;  %v1410_v6 = vsel %vm961_vm7, %v2587_v21, %v2591_v59  ;;  %v1417_v8 = vsel %vm961_vm7, %v2592_v24, %v2586_v22  ;;  %2372 = vmatpush1.bf16.msra.mxu1 %v2371_v51 }
 0x55d   : > { %v2347_v26 = vpack.c.bf16 %v1409_v38, %v3028_v35  ;;  %v2595_v4 = vpop.permute.xlu1 %2594  ;;  %v2345_v37 = vpack.c.bf16 %v1410_v6, %v3033_v52  ;;  %v2373_v20 = vpack.c.bf16 %v1417_v8, %v3036_v36  ;;  %v1440_v48 = vsel %vm1434_vm12, %v2601_v23, %v2602_v17 }
 0x55e   : > { %v2597_v13 = vunpack.i.h.bf16 %v2595_v4  ;;  %v2596_v42 = vunpack.i.l.bf16 %v2595_v4  ;;  %v2379_v27 = vpack.c.bf16 %v1440_v48, %v1437_v50 }
 0x55f   : > { %2346 = vmatprep.subr.bf16.mxu0 %v2345_v37  ;;  %2374 = vmatprep.subr.bf16.mxu1 %v2373_v20 }
 0x560   : > { %v1438_v35 = vsel %vm1434_vm12, %v2596_v42, %v2597_v13  ;;  %2348 = vmatpush1.bf16.msra.mxu0 %v2347_v26  ;;  %v1439_v52 = vsel %vm1434_vm12, %v2597_v13, %v2601_v23  ;;  %v1452_v36 = vsel %vm1434_vm12, %v2602_v17, %v2596_v42  ;;  %2376 = vmatpush1.bf16.msra.mxu1 %v2375_v32 }
 0x561   : > { %v2351_v31 = vpack.c.bf16 %v1438_v35, %v1435_v33  ;;  %v2349_v10 = vpack.c.bf16 %v1439_v52, %v1436_v43  ;;  %v2377_v47 = vpack.c.bf16 %v1452_v36, %v1451_v46 }
 0x563   : > { %2350 = vmatprep.subr.bf16.mxu0 %v2349_v10  ;;  %2378 = vmatprep.subr.bf16.mxu1 %v2377_v47 }
 0x564   : > { %2352 = vmatpush1.bf16.msra.mxu0 %v2351_v31  ;;  %2380 = vmatpush1.bf16.msra.mxu1 %v2379_v27 }
 0x565   : > { %2382 = vmatprep.subr.bf16.mxu0 %v2957_v61  ;;  %2406 = vmatprep.subr.bf16.mxu1 %v2968_v39  ;;  %v1456_v61 = vld [vmem:[%s3477_s8 + $0x18] sm:$0xff]  ;;  %v1457_v39 = vld [vmem:[%s3477_s8 + $0x20] sm:$0xff] }
 0x567   : > { %2253 = vmatmul.mubr.msk.f32.vlgmr.msra.gmra.mrb[18].mxu0 %vm1460_vm13, %v1453_v49  ;;  %2260 = vmatmul.mubr.msk.f32.vlgmr.msra.gmra.mrb[18].mxu1 %vm1460_vm13, %v1453_v49 }
 0x568   : > { %2384 = vmatpush1.bf16.msra.mxu0 %v2953_v53  ;;  %1552 = vmatprep.mubr.f32.mxu0 %v3494_v45  ;;  %v1455_v53 = vld [vmem:[%s3477_s8 + $0x10] sm:$0xff] }
 0x569   : > { %2408 = vmatpush1.bf16.msra.mxu1 %v2977_v5  ;;  %1659 = vmatprep.mubr.f32.mxu1 %v3494_v45  ;;  %v1458_v5 = vld [vmem:[%s3477_s8 + $0x28] sm:$0xff] }
 0x56b   : > { %2254 = vmatmul.mubr.msk.f32.gmra.mrb[20].mxu0 %vm1460_vm13, %v1454_v62  ;;  %2261 = vmatmul.mubr.msk.f32.gmra.mrb[20].mxu1 %vm1460_vm13, %v1454_v62 }
 0x56c   : > { %1558 = vmatprep.mubr.f32.mxu0 %v3494_v45  ;;  %1665 = vmatprep.mubr.f32.mxu1 %v3494_v45 }
 0x56e   : > { %v3331_v33 = vpop.permute.xlu1 %1851 }
 0x56f   : > { %2255 = vmatmul.mubr.msk.f32.gmra.mrb[22].mxu0 %vm1460_vm13, %v1455_v53  ;;  %2262 = vmatmul.mubr.msk.f32.gmra.mrb[22].mxu1 %vm1460_vm13, %v1455_v53 }
 0x570   : > { %1564 = vmatprep.mubr.f32.mxu0 %v3494_v45  ;;  %1671 = vmatprep.mubr.f32.mxu1 %v3494_v45 }
 0x573   : > { %2256 = vmatmul.mubr.msk.f32.gmra.mrb[24].mxu0 %vm1460_vm13, %v1456_v61  ;;  %2263 = vmatmul.mubr.msk.f32.gmra.mrb[24].mxu1 %vm1460_vm13, %v1456_v61 }
 0x574   : > { %1570 = vmatprep.mubr.f32.mxu0 %v3494_v45  ;;  %1677 = vmatprep.mubr.f32.mxu1 %v3494_v45 }
 0x577   : > { %2257 = vmatmul.mubr.msk.f32.gmra.mrb[26].mxu0 %vm1460_vm13, %v1457_v39  ;;  %2264 = vmatmul.mubr.msk.f32.gmra.mrb[26].mxu1 %vm1460_vm13, %v1457_v39 }
 0x578   : > { %1576 = vmatprep.mubr.f32.mxu0 %v3494_v45  ;;  %1683 = vmatprep.mubr.f32.mxu1 %v3494_v45 }
 0x57b   : > { %2258 = vmatmul.mubr.msk.f32.gmra.mrb[28].mxu0 %vm1460_vm13, %v1458_v5  ;;  %2265 = vmatmul.mubr.msk.f32.gmra.mrb[28].mxu1 %vm1460_vm13, %v1458_v5 }
 0x57c   : > { %1582 = vmatprep.mubr.f32.mxu0 %v3494_v45  ;;  %1689 = vmatprep.mubr.f32.mxu1 %v3494_v45 }
 0x57f   : > { %2259 = vmatmul.mubr.msk.f32.gmra.mrb[30].mxu0 %vm1460_vm13, %v1459_v60  ;;  %2266 = vmatmul.mubr.msk.f32.gmra.mrb[30].mxu1 %vm1460_vm13, %v1459_v60 }
 0x580   : > { %1981 = vmatprep.mubr.f32.mxu0 %v3494_v45  ;;  %2064 = vmatprep.mubr.f32.mxu1 %v3494_v45 }
 0x63a   : > { %v1548_v11 = vpop.f32.mrb[18].mxu0  ;;  %v1655_v24 = vpop.f32.mrb[18].mxu1 }
 0x63b   : > { %1703 = vrot.lane.b32.xlu0 %v1548_v11, %s2651_s19  ;;  %v1550_v56 = vpop.f32.mrb[19].mxu0  ;;  %v1657_v58 = vpop.f32.mrb[19].mxu1 }
 0x63c   : > { %1697 = vrot.lane.b32.xlu1 %v1657_v58, %s2651_s19 }
 0x63e   : > { %v1554_v59 = vpop.f32.mrb[20].mxu0  ;;  %v1661_v57 = vpop.f32.mrb[20].mxu1 }
 0x63f   : > { %1707 = vrot.lane.b32.xlu0 %v1655_v24, %s2651_s19  ;;  %v1556_v55 = vpop.f32.mrb[21].mxu0  ;;  %v1663_v15 = vpop.f32.mrb[21].mxu1 }
 0x640   : > { %1705 = vrot.lane.b32.xlu1 %v1550_v56, %s2651_s19 }
 0x642   : > { %v1560_v21 = vpop.f32.mrb[22].mxu0  ;;  %v1667_v2 = vpop.f32.mrb[22].mxu1 }
 0x643   : > { %1725 = vrot.lane.b32.xlu0 %v1554_v59, %s2647_s13  ;;  %v1562_v22 = vpop.f32.mrb[23].mxu0  ;;  %v1669_v7 = vpop.f32.mrb[23].mxu1 }
 0x644   : > { %1719 = vrot.lane.b32.xlu1 %v1663_v15, %s2647_s13 }
 0x646   : > { %v3310_v3 = vpop.f32.mrb[24].mxu0  ;;  %v3314_v28 = vpop.f32.mrb[24].mxu1 }
 0x647   : > { %1729 = vrot.lane.b32.xlu0 %v1661_v57, %s2647_s13  ;;  %v3312_v14 = vpop.f32.mrb[25].mxu0  ;;  %v3316_v51 = vpop.f32.mrb[25].mxu1 }
 0x648   : > { %1727 = vrot.lane.b32.xlu1 %v1556_v55, %s2647_s13  ;;  %s2652_s13 = smov 125  }
 0x64a   : > { %v1572_v38 = vpop.f32.mrb[26].mxu0  ;;  %v1679_v8 = vpop.f32.mrb[26].mxu1 }
 0x64b   : > { %1750 = vrot.lane.b32.xlu0 %v1560_v21, %s2643_s17  ;;  %v1574_v6 = vpop.f32.mrb[27].mxu0  ;;  %v1681_v40 = vpop.f32.mrb[27].mxu1 }
 0x64c   : > { %1744 = vrot.lane.b32.xlu1 %v1669_v7, %s2643_s17 }
 0x64e   : > { %v1578_v26 = vpop.f32.mrb[28].mxu0  ;;  %v1685_v37 = vpop.f32.mrb[28].mxu1 }
 0x64f   : > { %1754 = vrot.lane.b32.xlu0 %v1667_v2, %s2643_s17  ;;  %v1580_v4 = vpop.f32.mrb[29].mxu0  ;;  %v1687_v20 = vpop.f32.mrb[29].mxu1 }
 0x650   : > { %1752 = vrot.lane.b32.xlu1 %v1562_v22, %s2643_s17 }
 0x652   : > { %v1584_v17 = vpop.f32.mrb[30].mxu0  ;;  %v1691_v13 = vpop.f32.mrb[30].mxu1 }
 0x653   : > { %1778 = vrot.lane.b32.xlu0 %v1574_v6, %s2644_s18  ;;  %v1586_v23 = vpop.f32.mrb[31].mxu0  ;;  %v1693_v42 = vpop.f32.mrb[31].mxu1 }
 0x654   : > { %1776 = vrot.lane.b32.xlu1 %v1572_v38, %s2644_s18 }
 0x657   : > { %1782 = vrot.lane.b32.xlu0 %v1681_v40, %s2644_s18 }
 0x658   : > { %1780 = vrot.lane.b32.xlu1 %v1679_v8, %s2644_s18 }
 0x65b   : > { %1801 = vrot.lane.b32.xlu0 %v1578_v26, %s2648_s14 }
 0x65c   : > { %1803 = vrot.lane.b32.xlu1 %v1580_v4, %s2648_s14 }
 0x65f   : > { %1805 = vrot.lane.b32.xlu0 %v1685_v37, %s2648_s14 }
 0x660   : > { %1807 = vrot.lane.b32.xlu1 %v1687_v20, %s2648_s14 }
 0x663   : > { %1826 = vrot.lane.b32.xlu0 %v1584_v17, %s2652_s13 }
 0x664   : > { %1828 = vrot.lane.b32.xlu1 %v1586_v23, %s2652_s13 }
 0x667   : > { %1830 = vrot.lane.b32.xlu0 %v1691_v13, %s2652_s13 }
 0x668   : > { %1832 = vrot.lane.b32.xlu1 %v1693_v42, %s2652_s13 }
 0x6ad   : > { %v1704_v43 = vpop.permute.xlu0 %1703 }
 0x6ae   : > { %v1698_v46 = vpop.permute.xlu1 %1697 }
 0x6af   : > { %v1717_v11 = vsel %vm1709_vm14, %v1698_v46, %v1704_v43 }
 0x6b1   : > { %v1708_v35 = vpop.permute.xlu0 %1707 }
 0x6b2   : > { %v1706_v52 = vpop.permute.xlu1 %1705  ;;  %v1712_v38 = vsel %vm1709_vm14, %v1708_v35, %v1698_v46 }
 0x6b3   : > { %v1710_v56 = vsel %vm1709_vm14, %v1704_v43, %v1706_v52  ;;  %v1711_v6 = vsel %vm1709_vm14, %v1706_v52, %v1708_v35 }
 0x6b5   : > { %v1726_v36 = vpop.permute.xlu0 %1725 }
 0x6b6   : > { %v1720_v32 = vpop.permute.xlu1 %1719 }
 0x6b7   : > { %v1738_v61 = vsel %vm1204_vm9, %v1720_v32, %v1726_v36 }
 0x6b8   : > { %v1739_v59 = vadd.f32 %v1738_v61, %v1717_v11 }
 0x6b9   : > { %v1730_v31 = vpop.permute.xlu0 %1729 }
 0x6ba   : > { %v1728_v10 = vpop.permute.xlu1 %1727  ;;  %v1733_v57 = vsel %vm1204_vm9, %v1730_v31, %v1720_v32 }
 0x6bb   : > { %v1731_v39 = vsel %vm1204_vm9, %v1726_v36, %v1728_v10  ;;  %v1732_v15 = vsel %vm1204_vm9, %v1728_v10, %v1730_v31  ;;  %v1742_v26 = vadd.f32 %v1733_v57, %v1712_v38  ;;  %v3372_v38 = vld [vmem:[%s3470_s1 + $0x8] sm:$0xff] }
 0x6bc   : > { %v1740_v55 = vadd.f32 %v1731_v39, %v1710_v56  ;;  %v1741_v4 = vadd.f32 %v1732_v15, %v1711_v6 }
 0x6bd   : > { %v1751_v47 = vpop.permute.xlu0 %1750 }
 0x6be   : > { %v1745_v48 = vpop.permute.xlu1 %1744 }
 0x6bf   : > { %v1763_v24 = vsel %vm815_vm4, %v1745_v48, %v1751_v47 }
 0x6c0   : > { %v1764_v21 = vadd.f32 %v1763_v24, %v1739_v59 }
 0x6c1   : > { %v1755_v50 = vpop.permute.xlu0 %1754 }
 0x6c2   : > { %v1753_v49 = vpop.permute.xlu1 %1752  ;;  %v1758_v8 = vsel %vm815_vm4, %v1755_v50, %v1745_v48  ;;  %v1768_v13 = vadd.f32 %v1764_v21, %v3310_v3 }
 0x6c3   : > { %v1756_v58 = vsel %vm815_vm4, %v1751_v47, %v1753_v49  ;;  %v1757_v40 = vsel %vm815_vm4, %v1753_v49, %v1755_v50  ;;  %v1767_v17 = vadd.f32 %v1758_v8, %v1742_v26 }
 0x6c4   : > { %v1765_v22 = vadd.f32 %v1756_v58, %v1740_v55  ;;  %v1766_v23 = vadd.f32 %v1757_v40, %v1741_v4 }
 0x6c5   : > { %v1779_v27 = vpop.permute.xlu0 %1778  ;;  %v1771_v47 = vadd.f32 %v1767_v17, %v3316_v51 }
 0x6c6   : > { %v1777_v62 = vpop.permute.xlu1 %1776  ;;  %v1769_v42 = vadd.f32 %v1765_v22, %v3312_v14  ;;  %v1770_v48 = vadd.f32 %v1766_v23, %v3314_v28  ;;  %v3386_v23 = vld [vmem:[%s3470_s1 + $0x18] sm:$0xff] }
 0x6c7   : > { %v1784_v37 = vsel %vm840_vm5, %v1777_v62, %v1779_v27 }
 0x6c8   : > { %v1793_v36 = vadd.f32 %v1784_v37, %v1768_v13 }
 0x6c9   : > { %v1783_v53 = vpop.permute.xlu0 %1782 }
 0x6ca   : > { %v1781_v5 = vpop.permute.xlu1 %1780  ;;  %v1792_v31 = vsel %vm840_vm5, %v1783_v53, %v1777_v62 }
 0x6cb   : > { %v1785_v20 = vsel %vm840_vm5, %v1779_v27, %v1781_v5  ;;  %v1786_v10 = vsel %vm840_vm5, %v1781_v5, %v1783_v53  ;;  %v1796_v56 = vadd.f32 %v1792_v31, %v1771_v47 }
 0x6cc   : > { %v1794_v32 = vadd.f32 %v1785_v20, %v1769_v42  ;;  %v1795_v62 = vadd.f32 %v1786_v10, %v1770_v48  ;;  %v3380_v20 = vld [vmem:[%s3470_s1 + $0x10] sm:$0xff] }
 0x6cd   : > { %v1802_v60 = vpop.permute.xlu0 %1801 }
 0x6ce   : > { %v1804_v2 = vpop.permute.xlu1 %1803 }
 0x6cf   : > { %v1809_v35 = vsel %vm1279_vm10, %v1802_v60, %v1804_v2 }
 0x6d0   : > { %v1818_v3 = vadd.f32 %v1809_v35, %v1793_v36 }
 0x6d1   : > { %v1806_v7 = vpop.permute.xlu0 %1805 }
 0x6d2   : > { %v1808_v43 = vpop.permute.xlu1 %1807  ;;  %v1810_v52 = vsel %vm1279_vm10, %v1804_v2, %v1806_v7  ;;  %v3366_v2 = vld [vmem:[%s3470_s1] sm:$0xff] }
 0x6d3   : > { %v1819_v50 = vadd.f32 %v1810_v52, %v1794_v32  ;;  %v1811_v27 = vsel %vm1279_vm10, %v1806_v7, %v1808_v43  ;;  %v1817_v61 = vsel %vm1279_vm10, %v1808_v43, %v1802_v60 }
 0x6d4   : > { %v1820_v5 = vadd.f32 %v1811_v27, %v1795_v62  ;;  %v1821_v51 = vadd.f32 %v1817_v61, %v1796_v56 }
 0x6d5   : > { %v1827_v46 = vpop.permute.xlu0 %1826 }
 0x6d6   : > { %v1829_v14 = vpop.permute.xlu1 %1828 }
 0x6d7   : > { %v1835_v39 = vsel %vm1834_vm15, %v1827_v46, %v1829_v14 }
 0x6d8   : > { %v1844_v24 = vadd.f32 %v1835_v39, %v1818_v3 }
 0x6d9   : > { %v1831_v49 = vpop.permute.xlu0 %1830 }
 0x6da   : > { %v1836_v11 = vsel %vm1834_vm15, %v1829_v14, %v1831_v49  ;;  %v1854_v28 = vadd.f32 %v3331_v33, %v1844_v24  ;;  %v1833_v59 = vpop.permute.xlu1 %1832 }
 0x6db   : > { %v1845_v53 = vadd.f32 %v1836_v11, %v1819_v50  ;;  %v1837_v55 = vsel %vm1834_vm15, %v1831_v49, %v1833_v59  ;;  %v1843_v57 = vsel %vm1834_vm15, %v1833_v59, %v1827_v46  ;;  %v2133_v46 = vld [vmem:[%s3480_s11] sm:$0xff] }
 0x6dc   : > { %v1858_v60 = vmax.f32 %v1854_v28, 0.0  ;;  %v1846_v21 = vadd.f32 %v1837_v55, %v1820_v5  ;;  %v1847_v22 = vadd.f32 %v1843_v57, %v1821_v51  ;;  %v3497_v5 = vld [vmem:[#allocation5_spill] sm:$0xff]  ;;  %v1904_v57 = vld [vmem:[%s3479_s10] sm:$0xff] }
 0x6dd   : > { %v1855_v58 = vadd.f32 %v3331_v33, %v1845_v53 }
 0x6de   : > { %v1862_v7 = vmul.f32 %v3366_v2, %v1858_v60  ;;  %v1856_v8 = vadd.f32 %v3331_v33, %v1846_v21  ;;  %v1857_v40 = vadd.f32 %v3331_v33, %v1847_v22 }
 0x6df   : > { %v1859_v15 = vmax.f32 %v1855_v58, 0.0  ;;  %v3498_v58 = vld [vmem:[#allocation3_spill] sm:$0xff] }
 0x6e0   : > { %v1860_v26 = vmax.f32 %v1856_v8, 0.0  ;;  %v1861_v4 = vmax.f32 %v1857_v40, 0.0  ;;  %v2395_v53 = vpack.c.bf16 %v1862_v7, %v3136_v1 }
 0x6e1   : > { %v1863_v6 = vmul.f32 %v3372_v38, %v1859_v15 }
 0x6e2   : > { %v1864_v17 = vmul.f32 %v3380_v20, %v1860_v26  ;;  %v1865_v13 = vmul.f32 %v3386_v23, %v1861_v4 }
 0x6e3   : > { %v2613_v37 = vpack.i.bf16 %v1863_v6, %v1862_v7  ;;  %v2393_v56 = vpack.c.bf16 %v1863_v6, %v3127_v12 }
 0x6e4   : > { %v2603_v42 = vpack.i.bf16 %v1862_v7, %v1865_v13  ;;  %v2608_v43 = vpack.i.bf16 %v1864_v17, %v1863_v6  ;;  %v2618_v33 = vpack.i.bf16 %v1865_v13, %v1864_v17 }
 0x6e6   : > { %2604 = vrot.lane.b32.xlu0 %v2603_v42, %s2641_s23  ;;  %2609 = vrot.lane.b32.xlu1 %v2608_v43, %s2641_s23 }
 0x6ea   : > { %2614 = vrot.lane.b32.xlu0 %v2613_v37, %s2642_s24  ;;  %2619 = vrot.lane.b32.xlu1 %v2618_v33, %s2642_s24 }
 0x6ee   : > { %2136 = vperm.xlu0 %2451, %v2133_v46  }
 0x758   : > { %v2605_v35 = vpop.permute.xlu0 %2604  ;;  %v2610_v52 = vpop.permute.xlu1 %2609 }
 0x759   : > { %v2607_v36 = vunpack.i.h.bf16 %v2605_v35  ;;  %v2606_v32 = vunpack.i.l.bf16 %v2605_v35  ;;  %v2612_v31 = vunpack.i.h.bf16 %v2610_v52  ;;  %v2611_v10 = vunpack.i.l.bf16 %v2610_v52 }
 0x75b   : > { %v1886_v47 = vsel %vm596_vm1, %v2606_v32, %v2607_v36  ;;  %v1880_v48 = vsel %vm596_vm1, %v2611_v10, %v2612_v31  ;;  %v1879_v3 = vsel %vm596_vm1, %v2607_v36, %v2611_v10  ;;  %v1881_v50 = vsel %vm596_vm1, %v2612_v31, %v2606_v32 }
 0x75c   : > { %v2387_v14 = vpack.c.bf16 %v1886_v47, %v3184_v18  ;;  %v2411_v49 = vpack.c.bf16 %v1880_v48, %v3202_v44  ;;  %v2385_v27 = vpack.c.bf16 %v1879_v3, %v3187_v29  ;;  %v2409_v61 = vpack.c.bf16 %v1881_v50, %v3190_v30  ;;  %v2615_v39 = vpop.permute.xlu0 %2614  ;;  %v2620_v11 = vpop.permute.xlu1 %2619  ;;  %v3495_v30 = vld [vmem:[#allocation2_spill] sm:$0xff] }
 0x75d   : > { %v2417_v18 = vpack.c.bf16 %v1865_v13, %v3133_v25  ;;  %v2617_v62 = vunpack.i.h.bf16 %v2615_v39  ;;  %v2616_v44 = vunpack.i.l.bf16 %v2615_v39  ;;  %v2622_v24 = vunpack.i.h.bf16 %v2620_v11  ;;  %v3496_v25 = vld [vmem:[#allocation4_spill] sm:$0xff] }
 0x75e   : > { %2386 = vmatprep.subr.bf16.mxu0 %v2385_v27  ;;  %2410 = vmatprep.subr.bf16.mxu1 %v2409_v61  ;;  %v2621_v29 = vunpack.i.l.bf16 %v2620_v11 }
 0x75f   : > { %2388 = vmatpush1.bf16.msra.mxu0 %v2387_v14  ;;  %2412 = vmatpush1.bf16.msra.mxu1 %v2411_v49  ;;  %v1903_v12 = vsel %vm613_vm2, %v2622_v24, %v2616_v44 }
 0x760   : > { %2390 = vmatprep.subr.bf16.mxu0 %v2972_v0  ;;  %2414 = vmatprep.subr.bf16.mxu1 %v2987_v9  ;;  %v2419_v0 = vpack.c.bf16 %v1864_v17, %v3130_v34  ;;  %v1896_v9 = vsel %vm613_vm2, %v2617_v62, %v2621_v29  ;;  %v1897_v51 = vsel %vm613_vm2, %v2621_v29, %v2622_v24  ;;  %v3499_v34 = vld [vmem:[#allocation6_spill] sm:$0xff] }
 0x761   : > { %v2401_v28 = vpack.c.bf16 %v1896_v9, %v3221_v54  ;;  %v2425_v1 = vpack.c.bf16 %v1903_v12, %v3228_v16  ;;  %v2427_v55 = vpack.c.bf16 %v1897_v51, %v3215_v19  ;;  %v1905_v54 = vld [vmem:[%s3479_s10 + $0x8] sm:$0xff]  ;;  %v1906_v19 = vld [vmem:[%s3479_s10 + $0x10] sm:$0xff] }
 0x763   : > { %2392 = vmatpush1.bf16.msra.mxu0 %v2983_v41  ;;  %2416 = vmatpush1.bf16.msra.mxu1 %v3495_v30  ;;  %v1895_v41 = vsel %vm613_vm2, %v2616_v44, %v2617_v62 }
 0x764   : > { %2394 = vmatprep.subr.bf16.mxu0 %v2393_v56  ;;  %2418 = vmatprep.subr.bf16.mxu1 %v2417_v18  ;;  %v2403_v59 = vpack.c.bf16 %v1895_v41, %v3218_v63 }
 0x767   : > { %2396 = vmatpush1.bf16.msra.mxu0 %v2395_v53  ;;  %2420 = vmatpush1.bf16.msra.mxu1 %v2419_v0  ;;  %v2627_v53 = vld [vmem:[%s2739_s28] sm:$0xff] }
 0x768   : > { %2398 = vmatprep.subr.bf16.mxu0 %v3496_v25  ;;  %2422 = vmatprep.subr.bf16.mxu1 %v3497_v5 }
 0x76b   : > { %2400 = vmatpush1.bf16.msra.mxu0 %v3498_v58  ;;  %2424 = vmatpush1.bf16.msra.mxu1 %v3499_v34  ;;  %v2629_v34 = vld [vmem:[%s2739_s28 + $0x10] sm:$0xff] }
 0x76c   : > { %2402 = vmatprep.subr.bf16.mxu0 %v2401_v28  ;;  %2426 = vmatprep.subr.bf16.mxu1 %v2425_v1 }
 0x76d   : > { %v2137_v4 = vpop.permute.xlu0 %2136 }
 0x76f   : > { %2404 = vmatpush1.bf16.msra.mxu0 %v2403_v59  ;;  %2428 = vmatpush1.bf16.msra.mxu1 %v2427_v55  ;;  %v2630_v55 = vld [vmem:[%s2739_s28 + $0x18] sm:$0xff] }
 0x772   : > { %2267 = vmatmul.mubr.msk.f32.vlgmr.msra.gmra.mrb[32].mxu0 %vm1907_vm0, %v1904_v57  ;;  %2270 = vmatmul.mubr.msk.f32.vlgmr.msra.gmra.mrb[32].mxu1 %vm1907_vm0, %v1904_v57 }
 0x773   : > { %1987 = vmatprep.mubr.f32.mxu0 %v3494_v45  ;;  %2070 = vmatprep.mubr.f32.mxu1 %v3494_v45 }
 0x776   : > { %2268 = vmatmul.mubr.msk.f32.gmra.mrb[34].mxu0 %vm1907_vm0, %v1905_v54  ;;  %2271 = vmatmul.mubr.msk.f32.gmra.mrb[34].mxu1 %vm1907_vm0, %v1905_v54 }
 0x777   : > { %1993 = vmatprep.mubr.f32.mxu0 %v3494_v45  ;;  %2076 = vmatprep.mubr.f32.mxu1 %v3494_v45 }
 0x77a   : > { %2269 = vmatmul.mubr.msk.f32.gmra.mrb[36].mxu0 %vm1907_vm0, %v1906_v19  ;;  %2272 = vmatmul.mubr.msk.f32.gmra.mrb[36].mxu1 %vm1907_vm0, %v1906_v19 }
 0x845   : > { %v1983_v63 = vpop.f32.mrb[32].mxu0  ;;  %v2066_v16 = vpop.f32.mrb[32].mxu1 }
 0x846   : > { %2090 = vrot.lane.b32.xlu0 %v1983_v63, %s2643_s17  ;;  %v2068_v60 = vpop.f32.mrb[33].mxu1  ;;  %v1985_v15 = vpop.f32.mrb[33].mxu0 }
 0x847   : > { %2084 = vrot.lane.b32.xlu1 %v2068_v60, %s2643_s17 }
 0x849   : > { %v1989_v21 = vpop.f32.mrb[34].mxu0  ;;  %v2072_v22 = vpop.f32.mrb[34].mxu1 }
 0x84a   : > { %2094 = vrot.lane.b32.xlu0 %v2066_v16, %s2643_s17  ;;  %v1991_v7 = vpop.f32.mrb[35].mxu0  ;;  %v2074_v6 = vpop.f32.mrb[35].mxu1 }
 0x84b   : > { %2092 = vrot.lane.b32.xlu1 %v1985_v15, %s2643_s17 }
 0x84d   : > { %v1995_v8 = vpop.f32.mrb[36].mxu0  ;;  %v2078_v45 = vpop.f32.mrb[36].mxu1 }
 0x84e   : > { %v1997_v40 = vpop.f32.mrb[37].mxu0  ;;  %v2080_v26 = vpop.f32.mrb[37].mxu1 }
 0x84f   : > { %2114 = vrot.lane.b32.xlu0 %v1997_v40, %s2644_s18  ;;  %2112 = vrot.lane.b32.xlu1 %v1995_v8, %s2644_s18 }
 0x853   : > { %2116 = vrot.lane.b32.xlu1 %v2078_v45, %s2644_s18  ;;  %2118 = vrot.lane.b32.xlu0 %v2080_v26, %s2644_s18 }
 0x8b8   : > { %v2091_v37 = vpop.permute.xlu0 %2090 }
 0x8b9   : > { %v2085_v17 = vpop.permute.xlu1 %2084 }
 0x8ba   : > { %v2103_v43 = vsel %vm815_vm4, %v2085_v17, %v2091_v37 }
 0x8bb   : > { %v2104_v33 = vadd.f32 %v2103_v43, %v1989_v21 }
 0x8bc   : > { %v2095_v13 = vpop.permute.xlu0 %2094 }
 0x8bd   : > { %v2093_v42 = vpop.permute.xlu1 %2092  ;;  %v2098_v52 = vsel %vm815_vm4, %v2095_v13, %v2085_v17 }
 0x8be   : > { %v2096_v36 = vsel %vm815_vm4, %v2091_v37, %v2093_v42  ;;  %v2097_v32 = vsel %vm815_vm4, %v2093_v42, %v2095_v13  ;;  %v2107_v47 = vadd.f32 %v2098_v52, %v2074_v6 }
 0x8bf   : > { %v2105_v48 = vadd.f32 %v2096_v36, %v1991_v7  ;;  %v2106_v3 = vadd.f32 %v2097_v32, %v2072_v22 }
 0x8c1   : > { %v2115_v46 = vpop.permute.xlu0 %2114  ;;  %v2113_v35 = vpop.permute.xlu1 %2112 }
 0x8c2   : > { %v2120_v31 = vsel %vm840_vm5, %v2113_v35, %v2115_v46 }
 0x8c3   : > { %v2129_v10 = vadd.f32 %v2120_v31, %v2104_v33 }
 0x8c5   : > { %v2139_v50 = vadd.f32 %v2137_v4, %v2129_v10  ;;  %v2117_v14 = vpop.permute.xlu1 %2116  ;;  %v2119_v49 = vpop.permute.xlu0 %2118 }
 0x8c6   : > { %v2121_v27 = vsel %vm840_vm5, %v2115_v46, %v2117_v14  ;;  %v2122_v61 = vsel %vm840_vm5, %v2117_v14, %v2119_v49  ;;  %v2128_v39 = vsel %vm840_vm5, %v2119_v49, %v2113_v35 }
 0x8c7   : > { %v2143_v11 = vmax.f32 %v2139_v50, 0.0  ;;  %v2130_v56 = vadd.f32 %v2121_v27, %v2105_v48  ;;  %v2131_v18 = vadd.f32 %v2122_v61, %v2106_v3  ;;  %v2132_v62 = vadd.f32 %v2128_v39, %v2107_v47 }
 0x8c9   : > { %v2147_v44 = vmul.f32 %v3366_v2, %v2143_v11  ;;  %v2140_v24 = vadd.f32 %v2137_v4, %v2130_v56  ;;  %v2141_v29 = vadd.f32 %v2137_v4, %v2131_v18  ;;  %v2142_v30 = vadd.f32 %v2137_v4, %v2132_v62  ;;  %v2628_v2 = vld [vmem:[%s2739_s28 + $0x8] sm:$0xff] }
 0x8cb   : > { %v2151_v0 = vmul.f32 %v2627_v53, %v2147_v44  ;;  %v2144_v9 = vmax.f32 %v2140_v24, 0.0  ;;  %v2145_v12 = vmax.f32 %v2141_v29, 0.0  ;;  %v2146_v25 = vmax.f32 %v2142_v30, 0.0 }
 0x8cd   : > { %v2155_v5 = vsub.f32 %v2151_v0, %v2147_v44  ;;  %v2148_v41 = vmul.f32 %v3372_v38, %v2144_v9  ;;  %v2149_v51 = vmul.f32 %v3380_v20, %v2145_v12  ;;  %v2150_v28 = vmul.f32 %v3386_v23, %v2146_v25 }
 0x8cf   : > { %v2159_v1 = vadd.f32 1.0, %v2155_v5  ;;  %v2152_v58 = vmul.f32 %v2628_v2, %v2148_v41  ;;  %v2153_v59 = vmul.f32 %v2629_v34, %v2149_v51  ;;  %v2154_v57 = vmul.f32 %v2630_v55, %v2150_v28 }
 0x8d1   : > { %v2163_v54 = vmax.f32 %v2159_v1, 0.0  ;;  %v2156_v19 = vsub.f32 %v2152_v58, %v2148_v41  ;;  %v2157_v63 = vsub.f32 %v2153_v59, %v2149_v51  ;;  %v2158_v38 = vsub.f32 %v2154_v57, %v2150_v28 }
 0x8d3   : > { %2167 = vst [vmem:[%s413_s29] sm:$0xff] %v2163_v54  ;;  %v2160_v20 = vadd.f32 1.0, %v2156_v19  ;;  %v2161_v16 = vadd.f32 1.0, %v2157_v63  ;;  %v2162_v23 = vadd.f32 1.0, %v2158_v38 }
 0x8d5   : > { %v2164_v60 = vmax.f32 %v2160_v20, 0.0  ;;  %v2165_v15 = vmax.f32 %v2161_v16, 0.0  ;;  %v2166_v21 = vmax.f32 %v2162_v23, 0.0 }
 0x8d7   : > { %2168 = vst [vmem:[%s413_s29 + $0x8] sm:$0xff] %v2164_v60  ;;  %2169 = vst [vmem:[%s413_s29 + $0x10] sm:$0xff] %v2165_v15 }
 0x8d8   : > { %2170 = vst [vmem:[%s413_s29 + $0x18] sm:$0xff] %v2166_v21 }
 0x8d9 PF: > { %s22_s21 = sadd.s32 1, %s2637_s21  }
 0x8da   : > { %p19_p4 = scmp.ge.s32.totalorder %s22_s21, 4  }
 0x8dc   :  { %21 = sbr.rel (!%p19_p4) target bundleno = 1 (0x1), region = 98 }

</bundles_post_ra>
